<compile_context>
chip_gen: v5e
topology: v5e:2x2
jax: 0.10.0
libtpu: 0.0.40
codegen_flags: <defaults>
</compile_context>

<pallas_src>
import functools
import math

import jax
import jax.numpy as jnp
from jax.experimental import pallas as pl
from jax.experimental.pallas import tpu as pltpu


_VMEM_LIMIT = 40 * 1024 * 1024   # headroom under v7x's 64 MiB physical VMEM


# ----------------------------------------------------------------------------
# Kernel 1: (embedding folded into W_in) one-hot matmul + position projection
# ----------------------------------------------------------------------------
def _embed_proj_kernel(idx_ref, pos_ref, table_ref, w_pos_ref, b_ref, o_ref,
                       *, vocab):
    idx = idx_ref[...]                                          # [tm, 1] int32
    tm = idx.shape[0]
    iota = jax.lax.broadcasted_iota(jnp.int32, (tm, vocab), 1)
    onehot = (idx == iota).astype(jnp.float32)                  # [tm, V]
    out = (jnp.dot(onehot, table_ref[...], preferred_element_type=jnp.float32)
           + jnp.dot(pos_ref[...], w_pos_ref[...],
                     preferred_element_type=jnp.float32)
           + b_ref[...])
    o_ref[...] = out.astype(o_ref.dtype)


def _pick_row_tile(m):
    """Largest row tile (multiple of 8, <=1024) dividing m with >=2 grid steps."""
    for t in (1024, 512, 256, 128, 64, 32, 16, 8):
        if m % t == 0 and m // t >= 2:
            return t
    return m


def embed_proj_pallas(idxs, pos, table_fold, w_pos, b_in):
    B, S = idxs.shape
    M = B * S
    V, D = table_fold.shape
    tile_m = _pick_row_tile(M)

    kernel = functools.partial(_embed_proj_kernel, vocab=V)
    out = pl.pallas_call(
        kernel,
        out_shape=jax.ShapeDtypeStruct((M, D), jnp.float32),
        grid=(M // tile_m,),
        in_specs=[pl.BlockSpec((tile_m, 1), lambda i: (i, 0)),
                  pl.BlockSpec((tile_m, 2), lambda i: (i, 0)),
                  pl.BlockSpec((V, D), lambda i: (0, 0)),
                  pl.BlockSpec((2, D), lambda i: (0, 0)),
                  pl.BlockSpec((1, D), lambda i: (0, 0))],
        out_specs=pl.BlockSpec((tile_m, D), lambda i: (i, 0)),
        compiler_params=pltpu.CompilerParams(
            dimension_semantics=("parallel",),
            vmem_limit_bytes=_VMEM_LIMIT),
    )(idxs.reshape(M, 1), pos.reshape(M, 2), table_fold, w_pos, b_in)
    return out.reshape(B, S, D)


# ----------------------------------------------------------------------------
# Kernel 2: whole encoder stack (all layers) in one pallas_call
# ----------------------------------------------------------------------------
def _layernorm(z, g, b, eps):
    mu = jnp.mean(z, axis=-1, keepdims=True)
    var = jnp.mean(jnp.square(z - mu), axis=-1, keepdims=True)
    return (z - mu) * jax.lax.rsqrt(var + eps) * g + b


def _stack_kernel(bias_ref, x_ref,
                  wqkv_ref, bqkv_ref, wo_ref, bo_ref, g1_ref, be1_ref,
                  w1_ref, bf1_ref, w2_ref, bf2_ref, g2_ref, be2_ref,
                  o_ref, attn_ref, *, heads, window, eps):
    layer = pl.program_id(1)
    Bt, S, D = x_ref.shape
    M = Bt * S
    NW = M // window
    Dh = D // heads

    # Layer 0: seed the VMEM-resident residual stream from the input block.
    @pl.when(layer == 0)
    def _():
        o_ref[...] = x_ref[...]

    x = o_ref[...].reshape(M, D)                          # f32 residual stream

    # --- fused QKV projection (1/sqrt(Dh) pre-folded into the q columns) ----
    qkv = jnp.dot(x.astype(jnp.bfloat16), wqkv_ref[0],
                  preferred_element_type=jnp.float32) + bqkv_ref[0]   # [M, 3D]
    qkv3 = qkv.reshape(NW, window, 3 * D).astype(jnp.bfloat16)        # one cast

    # --- heads stacked along the window-batch axis (lane slices only) -------
    q_all = jnp.concatenate(
        [qkv3[:, :, h * Dh:(h + 1) * Dh] for h in range(heads)], axis=0)
    k_all = jnp.concatenate(
        [qkv3[:, :, D + h * Dh:D + (h + 1) * Dh] for h in range(heads)], axis=0)
    v_all = jnp.concatenate(
        [qkv3[:, :, 2 * D + h * Dh:2 * D + (h + 1) * Dh] for h in range(heads)],
        axis=0)                                           # [H*NW, W, Dh] bf16

    bias = bias_ref[...].reshape(NW, 1, window)           # f32 additive mask
    bias_all = jnp.concatenate([bias] * heads, axis=0)    # [H*NW, 1, W]

    # --- one score matmul / softmax / attend for all heads & windows --------
    s = jnp.einsum('nqd,nkd->nqk', q_all, k_all,
                   preferred_element_type=jnp.float32) + bias_all
    m = jnp.max(s, axis=-1, keepdims=True)
    p = jnp.exp(s - m)
    p = p * pl.reciprocal(jnp.sum(p, axis=-1, keepdims=True), approx=True)
    ctx = jnp.einsum('nqk,nkd->nqd', p.astype(jnp.bfloat16), v_all,
                     preferred_element_type=jnp.float32)  # [H*NW, W, Dh] f32

    # --- re-assemble heads into [M, D] via scratch, ONE K=D out-projection ---
    for h in range(heads):
        attn_ref[:, h * Dh:(h + 1) * Dh] = ctx[h * NW:(h + 1) * NW].reshape(M, Dh)
    y = jnp.dot(attn_ref[...].astype(jnp.bfloat16), wo_ref[0],
                preferred_element_type=jnp.float32) + bo_ref[0]

    x1 = _layernorm(x + y, g1_ref[0], be1_ref[0], eps)    # post-LN 1

    # --- feed-forward (ReLU) + add + LN2 -------------------------------------
    h1 = jnp.dot(x1.astype(jnp.bfloat16), w1_ref[0],
                 preferred_element_type=jnp.float32) + bf1_ref[0]
    h1 = jnp.maximum(h1, 0.0)
    z = jnp.dot(h1.astype(jnp.bfloat16), w2_ref[0],
                preferred_element_type=jnp.float32) + bf2_ref[0]
    x2 = _layernorm(x1 + z, g2_ref[0], be2_ref[0], eps)

    o_ref[...] = x2.reshape(Bt, S, D).astype(o_ref.dtype)


def _pick_batch_tile(B, S, D, F):
    """Largest divisor of B leaving >=2 parallel grid steps within a rough
    VMEM activation budget (falls back to 1)."""
    row_bytes = 4 * (3 * D + F + 4 * D)
    max_rows = max(S, (12 * 1024 * 1024) // row_bytes)
    best = 1
    for bt in range(1, B + 1):
        if B % bt == 0 and B // bt >= 2 and bt * S <= max_rows:
            best = bt
    return best


def encoder_stack_pallas(x, bias, sp, *, heads, window, eps=1e-5):
    B, S, D = x.shape
    _, n_win, W = bias.shape
    L = sp["wqkv"].shape[0]
    F = sp["w1"].shape[2]
    bt = _pick_batch_tile(B, S, D, F)

    kernel = functools.partial(_stack_kernel, heads=heads, window=window, eps=eps)

    def wspec(arr):
        nd = arr.ndim - 1
        return pl.BlockSpec((1,) + arr.shape[1:],
                            lambda b, l, nd=nd: (l,) + (0,) * nd)

    return pl.pallas_call(
        kernel,
        out_shape=jax.ShapeDtypeStruct((B, S, D), jnp.float32),
        grid=(B // bt, L),                               # layer axis innermost
        in_specs=[pl.BlockSpec((bt, n_win, W), lambda b, l: (b, 0, 0)),  # mask bias
                  pl.BlockSpec((bt, S, D), lambda b, l: (b, 0, 0)),      # x (layer-0 seed)
                  wspec(sp["wqkv"]), wspec(sp["bqkv"]),
                  wspec(sp["wo"]), wspec(sp["bo"]),
                  wspec(sp["ln1_g"]), wspec(sp["ln1_b"]),
                  wspec(sp["w1"]), wspec(sp["b1"]),
                  wspec(sp["w2"]), wspec(sp["b2"]),
                  wspec(sp["ln2_g"]), wspec(sp["ln2_b"])],
        out_specs=pl.BlockSpec((bt, S, D), lambda b, l: (b, 0, 0)),
        scratch_shapes=[pltpu.VMEM((bt * S, D), jnp.float32)],
        input_output_aliases={1: 0},          # residual stream reuses x's HBM buffer
        compiler_params=pltpu.CompilerParams(
            dimension_semantics=("parallel", "arbitrary"),
            vmem_limit_bytes=_VMEM_LIMIT),
    )(bias, x,
      sp["wqkv"], sp["bqkv"], sp["wo"], sp["bo"],
      sp["ln1_g"], sp["ln1_b"], sp["w1"], sp["b1"],
      sp["w2"], sp["b2"], sp["ln2_g"], sp["ln2_b"])


# ----------------------------------------------------------------------------
# Forward pass
# ----------------------------------------------------------------------------
@functools.partial(jax.jit, static_argnames=("heads", "window"))
def local_road_env_encoder(idxs_src_tokens, pos_src_tokens, src_mask, packed,
                           *, heads, window):
    B, S = idxs_src_tokens.shape
    assert S % window == 0  # TODO(synk): pad ragged sequences to a window multiple
    n_win = S // window

    # embedding + pos/max_dist + Linear->dim_model (table/scale folded at pack time)
    x = embed_proj_pallas(idxs_src_tokens, pos_src_tokens,
                          packed["table_fold"], packed["w_pos"], packed["b_in"])

    # key-padding mask (True = valid) -> per-window additive bias, f32
    bias = jnp.where(src_mask, 0.0, -1e9).astype(jnp.float32).reshape(B, n_win, window)

    # all encoder layers in one fused kernel
    return encoder_stack_pallas(x, bias, packed["stack"], heads=heads, window=window)


# ----------------------------------------------------------------------------
# Parameters: PyTorch-shaped init + packing into the fused/stacked kernel layout
# ----------------------------------------------------------------------------
def init_params(key, vocab, emb_dim, dim_model, dim_ff, num_layers):
    keys = jax.random.split(key, 2 + num_layers)

    def w(k, shape, scale=0.02):
        return (scale * jax.random.normal(k, shape)).astype(jnp.float32)

    emb = w(keys[0], (vocab, emb_dim))
    emb = emb.at[vocab - 1].set(0.0)   # padding_idx = -1  ->  row vocab-1 zeroed

    params = {
        "emb": emb,
        "w_in": w(keys[1], (emb_dim + 2, dim_model)),
        "b_in": jnp.zeros((dim_model,), jnp.float32),
        "layers": [],
    }
    for l in range(num_layers):
        lk = jax.random.split(keys[2 + l], 6)
        params["layers"].append({
            "wq": w(lk[0], (dim_model, dim_model)), "bq": jnp.zeros((dim_model,), jnp.float32),
            "wk": w(lk[1], (dim_model, dim_model)), "bk": jnp.zeros((dim_model,), jnp.float32),
            "wv": w(lk[2], (dim_model, dim_model)), "bv": jnp.zeros((dim_model,), jnp.float32),
            "wo": w(lk[3], (dim_model, dim_model)), "bo": jnp.zeros((dim_model,), jnp.float32),
            "ln1_g": jnp.ones((dim_model,), jnp.float32),
            "ln1_b": jnp.zeros((dim_model,), jnp.float32),
            "w1": w(lk[4], (dim_model, dim_ff)), "b1": jnp.zeros((dim_ff,), jnp.float32),
            "w2": w(lk[5], (dim_ff, dim_model)), "b2": jnp.zeros((dim_model,), jnp.float32),
            "ln2_g": jnp.ones((dim_model,), jnp.float32),
            "ln2_b": jnp.zeros((dim_model,), jnp.float32),
        })
    return params


def pack_params(params, *, heads, max_dist):
    """Fold embedding table + pos scaling into the input projection, fuse QKV,
    fold the 1/sqrt(Dh) scale, stack per-layer weights on a leading layer axis,
    cast matmul weights to bf16 (biases / LN params stay f32)."""
    E = params["emb"].shape[1]
    D = params["w_in"].shape[1]
    Dh = D // heads
    scale = 1.0 / math.sqrt(Dh)

    packed = {
        "table_fold": (params["emb"] @ params["w_in"][:E]).astype(jnp.float32),   # [V, D]
        "w_pos": (params["w_in"][E:] / max_dist).astype(jnp.float32),             # [2, D]
        "b_in": params["b_in"].reshape(1, D).astype(jnp.float32),
    }

    def stk(fn, dtype):
        return jnp.stack([fn(lp) for lp in params["layers"]], axis=0).astype(dtype)

    packed["stack"] = {
        "wqkv": stk(lambda lp: jnp.concatenate(
            [lp["wq"] * scale, lp["wk"], lp["wv"]], axis=1), jnp.bfloat16),        # [L, D, 3D]
        "bqkv": stk(lambda lp: jnp.concatenate(
            [lp["bq"] * scale, lp["bk"], lp["bv"]]).reshape(1, 3 * D), jnp.float32),
        "wo": stk(lambda lp: lp["wo"], jnp.bfloat16),                              # [L, D, D]
        "bo": stk(lambda lp: lp["bo"].reshape(1, D), jnp.float32),
        "ln1_g": stk(lambda lp: lp["ln1_g"].reshape(1, D), jnp.float32),
        "ln1_b": stk(lambda lp: lp["ln1_b"].reshape(1, D), jnp.float32),
        "w1": stk(lambda lp: lp["w1"], jnp.bfloat16),                              # [L, D, F]
        "b1": stk(lambda lp: lp["b1"].reshape(1, -1), jnp.float32),
        "w2": stk(lambda lp: lp["w2"], jnp.bfloat16),                              # [L, F, D]
        "b2": stk(lambda lp: lp["b2"].reshape(1, D), jnp.float32),
        "ln2_g": stk(lambda lp: lp["ln2_g"].reshape(1, D), jnp.float32),
        "ln2_b": stk(lambda lp: lp["ln2_b"].reshape(1, D), jnp.float32),
    }
    return packed


if __name__ == "__main__":
    # Small shapes consistent with the module (scaled-down hyperparameters)
    B, S = 2, 8                 # batch, road-env tokens
    VOCAB, EMB = 11, 4          # size_encoder_vocab, dim_encoder_semantic_embedding
    DIM_MODEL = 32              # dim_model
    DIM_HEADS = 8               # dim_heads_encoder  -> heads = 4
    HEADS = DIM_MODEL // DIM_HEADS
    DIM_FF = 64                 # dim_feedforward
    NUM_LAYERS = 2              # num_encoder_layers
    WINDOW = 8                  # dim_attn_window_encoder (== S here)
    MAX_DIST = 50.0

    key = jax.random.PRNGKey(0)
    k_par, k_idx, k_pos = jax.random.split(key, 3)

    params = init_params(k_par, VOCAB, EMB, DIM_MODEL, DIM_FF, NUM_LAYERS)
    packed = pack_params(params, heads=HEADS, max_dist=MAX_DIST)

    idxs_src_tokens = jax.random.randint(k_idx, (B, S), 0, VOCAB, dtype=jnp.int32)
    pos_src_tokens = jax.random.uniform(k_pos, (B, S, 2), jnp.float32,
                                        minval=-MAX_DIST, maxval=MAX_DIST)
    src_mask = jnp.ones((B, S), dtype=bool).at[:, -2:].set(False)  # last 2 = pad

    out = local_road_env_encoder(idxs_src_tokens, pos_src_tokens, src_mask,
                                 packed, heads=HEADS, window=WINDOW)
    jax.block_until_ready(out)
    assert out.shape == (B, S, DIM_MODEL) and out.dtype == jnp.float32
    assert bool(jnp.all(jnp.isfinite(out)))
    print("KERNEL_OK")
</pallas_src>

<mosaic_0001>
module attributes {stable_mosaic.version = 11 : i64} {
  func.func @_embed_proj_kernel(%arg0: i32, %arg1: memref<8x1xi32, #tpu.memory_space<vmem>>, %arg2: memref<8x2xf32, #tpu.memory_space<vmem>>, %arg3: memref<11x32xf32, #tpu.memory_space<vmem>>, %arg4: memref<2x32xf32, #tpu.memory_space<vmem>>, %arg5: memref<1x32xf32, #tpu.memory_space<vmem>>, %arg6: memref<8x32xf32, #tpu.memory_space<vmem>>) attributes {dimension_semantics = [#tpu.dimension_semantics<parallel>], iteration_bounds = array<i64: 2>, scalar_prefetch = 0 : i64, scratch_operands = 0 : i64, tpu.core_type = #tpu.core_type<tc>, window_params = [{transform_indices = @transform_0, window_bounds = array<i64: 8, 1>}, {transform_indices = @transform_1, window_bounds = array<i64: 8, 2>}, {pipeline_mode = #tpu.pipeline_mode<synchronous>, transform_indices = @transform_2, window_bounds = array<i64: 11, 32>}, {pipeline_mode = #tpu.pipeline_mode<synchronous>, transform_indices = @transform_3, window_bounds = array<i64: 2, 32>}, {pipeline_mode = #tpu.pipeline_mode<synchronous>, transform_indices = @transform_4, window_bounds = array<i64: 1, 32>}, {transform_indices = @transform_5, window_bounds = array<i64: 8, 32>}]} {
    %c0 = arith.constant 0 : index
    %c0_0 = arith.constant 0 : index
    %0 = vector.load %arg1[%c0, %c0_0] : memref<8x1xi32, #tpu.memory_space<vmem>>, vector<8x1xi32>
    %1 = tpu.iota {dimensions = array<i32: 1>} : vector<8x11xi32>
    %2 = vector.broadcast %0 : vector<8x1xi32> to vector<8x11xi32>
    %3 = arith.cmpi eq, %2, %1 : vector<8x11xi32>
    %4 = arith.extui %3 : vector<8x11xi1> to vector<8x11xi32>
    %5 = arith.sitofp %4 : vector<8x11xi32> to vector<8x11xf32>
    %c0_1 = arith.constant 0 : index
    %c0_2 = arith.constant 0 : index
    %6 = vector.load %arg3[%c0_1, %c0_2] : memref<11x32xf32, #tpu.memory_space<vmem>>, vector<11x32xf32>
    %cst = arith.constant dense<0.000000e+00> : vector<8x32xf32>
    %7 = tpu.matmul %5, %6, %cst {dimension_numbers = #tpu.dot_dimension_numbers<[1], [0], [0], [1], [0, 0, 1, 1], [], []>} : vector<8x11xf32>, vector<11x32xf32>, vector<8x32xf32> -> vector<8x32xf32>
    %c0_3 = arith.constant 0 : index
    %c0_4 = arith.constant 0 : index
    %8 = vector.load %arg2[%c0_3, %c0_4] : memref<8x2xf32, #tpu.memory_space<vmem>>, vector<8x2xf32>
    %c0_5 = arith.constant 0 : index
    %c0_6 = arith.constant 0 : index
    %9 = vector.load %arg4[%c0_5, %c0_6] : memref<2x32xf32, #tpu.memory_space<vmem>>, vector<2x32xf32>
    %cst_7 = arith.constant dense<0.000000e+00> : vector<8x32xf32>
    %10 = tpu.matmul %8, %9, %cst_7 {dimension_numbers = #tpu.dot_dimension_numbers<[1], [0], [0], [1], [0, 0, 1, 1], [], []>} : vector<8x2xf32>, vector<2x32xf32>, vector<8x32xf32> -> vector<8x32xf32>
    %11 = arith.addf %7, %10 : vector<8x32xf32>
    %c0_8 = arith.constant 0 : index
    %c0_9 = arith.constant 0 : index
    %12 = vector.load %arg5[%c0_8, %c0_9] : memref<1x32xf32, #tpu.memory_space<vmem>>, vector<1x32xf32>
    %13 = vector.broadcast %12 : vector<1x32xf32> to vector<8x32xf32>
    %14 = arith.addf %11, %13 : vector<8x32xf32>
    %c0_10 = arith.constant 0 : index
    %c0_11 = arith.constant 0 : index
    %15 = vector.load %arg6[%c0_10, %c0_11] : memref<8x32xf32, #tpu.memory_space<vmem>>, vector<8x32xf32>
    tpu.vector_store %arg6[%c0_10, %c0_11], %14 {strides = array<i32>} : memref<8x32xf32, #tpu.memory_space<vmem>>, vector<8x32xf32>,
    return
  }
  func.func @transform_0(%arg0: i32) -> (i32, i32) {
    %c0_i32 = arith.constant 0 : i32
    %c0_i32_0 = arith.constant 0 : i32
    return %arg0, %c0_i32 : i32, i32
  }
  func.func @transform_1(%arg0: i32) -> (i32, i32) {
    %c0_i32 = arith.constant 0 : i32
    %c0_i32_0 = arith.constant 0 : i32
    return %arg0, %c0_i32 : i32, i32
  }
  func.func @transform_2(%arg0: i32) -> (i32, i32) {
    %c0_i32 = arith.constant 0 : i32
    %c0_i32_0 = arith.constant 0 : i32
    %c0_i32_1 = arith.constant 0 : i32
    return %c0_i32, %c0_i32_0 : i32, i32
  }
  func.func @transform_3(%arg0: i32) -> (i32, i32) {
    %c0_i32 = arith.constant 0 : i32
    %c0_i32_0 = arith.constant 0 : i32
    %c0_i32_1 = arith.constant 0 : i32
    return %c0_i32, %c0_i32_0 : i32, i32
  }
  func.func @transform_4(%arg0: i32) -> (i32, i32) {
    %c0_i32 = arith.constant 0 : i32
    %c0_i32_0 = arith.constant 0 : i32
    %c0_i32_1 = arith.constant 0 : i32
    return %c0_i32, %c0_i32_0 : i32, i32
  }
  func.func @transform_5(%arg0: i32) -> (i32, i32) {
    %c0_i32 = arith.constant 0 : i32
    %c0_i32_0 = arith.constant 0 : i32
    return %arg0, %c0_i32 : i32, i32
  }
}

module attributes {stable_mosaic.version = 11 : i64} {
  func.func @_stack_kernel(%arg0: i32, %arg1: i32, %arg2: memref<1x1x8xf32, #tpu.memory_space<vmem>>, %arg3: memref<1x8x32xf32, #tpu.memory_space<vmem>>, %arg4: memref<1x32x96xbf16, #tpu.memory_space<vmem>>, %arg5: memref<1x1x96xf32, #tpu.memory_space<vmem>>, %arg6: memref<1x32x32xbf16, #tpu.memory_space<vmem>>, %arg7: memref<1x1x32xf32, #tpu.memory_space<vmem>>, %arg8: memref<1x1x32xf32, #tpu.memory_space<vmem>>, %arg9: memref<1x1x32xf32, #tpu.memory_space<vmem>>, %arg10: memref<1x32x64xbf16, #tpu.memory_space<vmem>>, %arg11: memref<1x1x64xf32, #tpu.memory_space<vmem>>, %arg12: memref<1x64x32xbf16, #tpu.memory_space<vmem>>, %arg13: memref<1x1x32xf32, #tpu.memory_space<vmem>>, %arg14: memref<1x1x32xf32, #tpu.memory_space<vmem>>, %arg15: memref<1x1x32xf32, #tpu.memory_space<vmem>>, %arg16: memref<1x8x32xf32, #tpu.memory_space<vmem>>, %arg17: memref<8x32xf32, #tpu.memory_space<vmem>>) attributes {dimension_semantics = [#tpu.dimension_semantics<parallel>, #tpu.dimension_semantics<arbitrary>], iteration_bounds = array<i64: 2, 2>, scalar_prefetch = 0 : i64, scratch_operands = 1 : i64, tpu.core_type = #tpu.core_type<tc>, window_params = [{transform_indices = @transform_0, window_bounds = array<i64: 1, 1, 8>}, {transform_indices = @transform_1, window_bounds = array<i64: 1, 8, 32>}, {transform_indices = @transform_2, window_bounds = array<i64: 1, 32, 96>}, {transform_indices = @transform_3, window_bounds = array<i64: 1, 1, 96>}, {transform_indices = @transform_4, window_bounds = array<i64: 1, 32, 32>}, {transform_indices = @transform_5, window_bounds = array<i64: 1, 1, 32>}, {transform_indices = @transform_6, window_bounds = array<i64: 1, 1, 32>}, {transform_indices = @transform_7, window_bounds = array<i64: 1, 1, 32>}, {transform_indices = @transform_8, window_bounds = array<i64: 1, 32, 64>}, {transform_indices = @transform_9, window_bounds = array<i64: 1, 1, 64>}, {transform_indices = @transform_10, window_bounds = array<i64: 1, 64, 32>}, {transform_indices = @transform_11, window_bounds = array<i64: 1, 1, 32>}, {transform_indices = @transform_12, window_bounds = array<i64: 1, 1, 32>}, {transform_indices = @transform_13, window_bounds = array<i64: 1, 1, 32>}, {transform_indices = @transform_14, window_bounds = array<i64: 1, 8, 32>}]} {
    %c0_i32 = arith.constant 0 : i32
    %0 = arith.cmpi eq, %arg1, %c0_i32 : i32
    %1 = arith.extui %0 : i1 to i32
    %c0_i32_0 = arith.constant 0 : i32
    %2 = arith.cmpi ne, %1, %c0_i32_0 : i32
    scf.if %2 {
      %c0_70 = arith.constant 0 : index
      %c0_71 = arith.constant 0 : index
      %c0_72 = arith.constant 0 : index
      %142 = vector.load %arg3[%c0_70, %c0_71, %c0_72] : memref<1x8x32xf32, #tpu.memory_space<vmem>>, vector<1x8x32xf32>
      %c0_73 = arith.constant 0 : index
      %c0_74 = arith.constant 0 : index
      %c0_75 = arith.constant 0 : index
      %143 = vector.load %arg16[%c0_73, %c0_74, %c0_75] : memref<1x8x32xf32, #tpu.memory_space<vmem>>, vector<1x8x32xf32>
      tpu.vector_store %arg16[%c0_73, %c0_74, %c0_75], %142 {strides = array<i32>} : memref<1x8x32xf32, #tpu.memory_space<vmem>>, vector<1x8x32xf32>,
    } else {
    }
    %c0 = arith.constant 0 : index
    %c0_1 = arith.constant 0 : index
    %c0_2 = arith.constant 0 : index
    %3 = vector.load %arg16[%c0, %c0_1, %c0_2] : memref<1x8x32xf32, #tpu.memory_space<vmem>>, vector<1x8x32xf32>
    %4 = vector.shape_cast %3 : vector<1x8x32xf32> to vector<8x32xf32>
    %5 = arith.truncf %4 : vector<8x32xf32> to vector<8x32xbf16>
    %c0_3 = arith.constant 0 : index
    %c0_4 = arith.constant 0 : index
    %c0_5 = arith.constant 0 : index
    %6 = vector.load %arg4[%c0_3, %c0_4, %c0_5] : memref<1x32x96xbf16, #tpu.memory_space<vmem>>, vector<1x32x96xbf16>
    %7 = vector.shape_cast %6 : vector<1x32x96xbf16> to vector<32x96xbf16>
    %cst = arith.constant dense<0.000000e+00> : vector<8x96xf32>
    %8 = tpu.matmul %5, %7, %cst {dimension_numbers = #tpu.dot_dimension_numbers<[1], [0], [0], [1], [0, 0, 1, 1], [], []>} : vector<8x32xbf16>, vector<32x96xbf16>, vector<8x96xf32> -> vector<8x96xf32>
    %c0_6 = arith.constant 0 : index
    %c0_7 = arith.constant 0 : index
    %c0_8 = arith.constant 0 : index
    %9 = vector.load %arg5[%c0_6, %c0_7, %c0_8] : memref<1x1x96xf32, #tpu.memory_space<vmem>>, vector<1x1x96xf32>
    %10 = vector.shape_cast %9 : vector<1x1x96xf32> to vector<1x96xf32>
    %11 = vector.broadcast %10 : vector<1x96xf32> to vector<8x96xf32>
    %12 = arith.addf %8, %11 : vector<8x96xf32>
    %13 = vector.shape_cast %12 : vector<8x96xf32> to vector<1x8x96xf32>
    %14 = arith.truncf %13 : vector<1x8x96xf32> to vector<1x8x96xbf16>
    %15 = vector.extract_strided_slice %14 {offsets = [0, 0, 0], sizes = [1, 8, 8], strides = [1, 1, 1]} : vector<1x8x96xbf16> to vector<1x8x8xbf16>
    %16 = vector.extract_strided_slice %14 {offsets = [0, 0, 8], sizes = [1, 8, 8], strides = [1, 1, 1]} : vector<1x8x96xbf16> to vector<1x8x8xbf16>
    %17 = vector.extract_strided_slice %14 {offsets = [0, 0, 16], sizes = [1, 8, 8], strides = [1, 1, 1]} : vector<1x8x96xbf16> to vector<1x8x8xbf16>
    %18 = vector.extract_strided_slice %14 {offsets = [0, 0, 24], sizes = [1, 8, 8], strides = [1, 1, 1]} : vector<1x8x96xbf16> to vector<1x8x8xbf16>
    %19 = tpu.concatenate %15, %16, %17, %18 in 0 : vector<1x8x8xbf16>, vector<1x8x8xbf16>, vector<1x8x8xbf16>, vector<1x8x8xbf16> -> vector<4x8x8xbf16>
    %20 = vector.extract_strided_slice %14 {offsets = [0, 0, 32], sizes = [1, 8, 8], strides = [1, 1, 1]} : vector<1x8x96xbf16> to vector<1x8x8xbf16>
    %21 = vector.extract_strided_slice %14 {offsets = [0, 0, 40], sizes = [1, 8, 8], strides = [1, 1, 1]} : vector<1x8x96xbf16> to vector<1x8x8xbf16>
    %22 = vector.extract_strided_slice %14 {offsets = [0, 0, 48], sizes = [1, 8, 8], strides = [1, 1, 1]} : vector<1x8x96xbf16> to vector<1x8x8xbf16>
    %23 = vector.extract_strided_slice %14 {offsets = [0, 0, 56], sizes = [1, 8, 8], strides = [1, 1, 1]} : vector<1x8x96xbf16> to vector<1x8x8xbf16>
    %24 = tpu.concatenate %20, %21, %22, %23 in 0 : vector<1x8x8xbf16>, vector<1x8x8xbf16>, vector<1x8x8xbf16>, vector<1x8x8xbf16> -> vector<4x8x8xbf16>
    %25 = vector.extract_strided_slice %14 {offsets = [0, 0, 64], sizes = [1, 8, 8], strides = [1, 1, 1]} : vector<1x8x96xbf16> to vector<1x8x8xbf16>
    %26 = vector.extract_strided_slice %14 {offsets = [0, 0, 72], sizes = [1, 8, 8], strides = [1, 1, 1]} : vector<1x8x96xbf16> to vector<1x8x8xbf16>
    %27 = vector.extract_strided_slice %14 {offsets = [0, 0, 80], sizes = [1, 8, 8], strides = [1, 1, 1]} : vector<1x8x96xbf16> to vector<1x8x8xbf16>
    %28 = vector.extract_strided_slice %14 {offsets = [0, 0, 88], sizes = [1, 8, 8], strides = [1, 1, 1]} : vector<1x8x96xbf16> to vector<1x8x8xbf16>
    %29 = tpu.concatenate %25, %26, %27, %28 in 0 : vector<1x8x8xbf16>, vector<1x8x8xbf16>, vector<1x8x8xbf16>, vector<1x8x8xbf16> -> vector<4x8x8xbf16>
    %c0_9 = arith.constant 0 : index
    %c0_10 = arith.constant 0 : index
    %c0_11 = arith.constant 0 : index
    %30 = vector.load %arg2[%c0_9, %c0_10, %c0_11] : memref<1x1x8xf32, #tpu.memory_space<vmem>>, vector<1x1x8xf32>
    %31 = tpu.concatenate %30, %30, %30, %30 in 0 : vector<1x1x8xf32>, vector<1x1x8xf32>, vector<1x1x8xf32>, vector<1x1x8xf32> -> vector<4x1x8xf32>
    "tpu.trace_start"() <{level = 10 : i32, message = "nqd,nkd->nqk"}> : () -> ()
    %cst_12 = arith.constant dense<0.000000e+00> : vector<4x8x8xf32>
    %32 = tpu.matmul %19, %24, %cst_12 {dimension_numbers = #tpu.dot_dimension_numbers<[2], [2], [1], [1], [0, 0, 0, 1, 1, 1], [0], [0]>} : vector<4x8x8xbf16>, vector<4x8x8xbf16>, vector<4x8x8xf32> -> vector<4x8x8xf32>
    "tpu.trace_stop"() : () -> ()
    %33 = vector.broadcast %31 : vector<4x1x8xf32> to vector<4x8x8xf32>
    %34 = arith.addf %32, %33 : vector<4x8x8xf32>
    %cst_13 = arith.constant dense<0xFF800000> : vector<4x8xf32>
    %35 = vector.multi_reduction <maximumf>, %34, %cst_13 [2] : vector<4x8x8xf32> to vector<4x8xf32>
    %36 = vector.shape_cast %35 : vector<4x8xf32> to vector<4x8x1xf32>
    %37 = vector.broadcast %36 : vector<4x8x1xf32> to vector<4x8x8xf32>
    %38 = arith.subf %34, %37 : vector<4x8x8xf32>
    %39 = math.exp %38 : vector<4x8x8xf32>
    %cst_14 = arith.constant dense<0.000000e+00> : vector<4x8xf32>
    %40 = vector.multi_reduction <add>, %39, %cst_14 [2] : vector<4x8x8xf32> to vector<4x8xf32>
    %41 = vector.shape_cast %40 : vector<4x8xf32> to vector<4x8x1xf32>
    %42 = tpu.reciprocal %41 {approx = true} : vector<4x8x1xf32> -> vector<4x8x1xf32>
    %43 = vector.broadcast %42 : vector<4x8x1xf32> to vector<4x8x8xf32>
    %44 = arith.mulf %39, %43 : vector<4x8x8xf32>
    %45 = arith.truncf %44 : vector<4x8x8xf32> to vector<4x8x8xbf16>
    "tpu.trace_start"() <{level = 10 : i32, message = "nqk,nkd->nqd"}> : () -> ()
    %cst_15 = arith.constant dense<0.000000e+00> : vector<4x8x8xf32>
    %46 = tpu.matmul %45, %29, %cst_15 {dimension_numbers = #tpu.dot_dimension_numbers<[2], [1], [1], [2], [0, 0, 0, 1, 1, 2], [0], [0]>} : vector<4x8x8xbf16>, vector<4x8x8xbf16>, vector<4x8x8xf32> -> vector<4x8x8xf32>
    "tpu.trace_stop"() : () -> ()
    %47 = vector.extract_strided_slice %46 {offsets = [0, 0, 0], sizes = [1, 8, 8], strides = [1, 1, 1]} : vector<4x8x8xf32> to vector<1x8x8xf32>
    %48 = vector.shape_cast %47 : vector<1x8x8xf32> to vector<8x8xf32>
    %c0_16 = arith.constant 0 : index
    %c0_17 = arith.constant 0 : index
    %49 = vector.load %arg17[%c0_16, %c0_17] : memref<8x32xf32, #tpu.memory_space<vmem>>, vector<8x8xf32>
    tpu.vector_store %arg17[%c0_16, %c0_17], %48 {strides = array<i32>} : memref<8x32xf32, #tpu.memory_space<vmem>>, vector<8x8xf32>,
    %50 = vector.extract_strided_slice %46 {offsets = [1, 0, 0], sizes = [1, 8, 8], strides = [1, 1, 1]} : vector<4x8x8xf32> to vector<1x8x8xf32>
    %51 = vector.shape_cast %50 : vector<1x8x8xf32> to vector<8x8xf32>
    %c0_18 = arith.constant 0 : index
    %c8 = arith.constant 8 : index
    %52 = vector.load %arg17[%c0_18, %c8] : memref<8x32xf32, #tpu.memory_space<vmem>>, vector<8x8xf32>
    tpu.vector_store %arg17[%c0_18, %c8], %51 {strides = array<i32>} : memref<8x32xf32, #tpu.memory_space<vmem>>, vector<8x8xf32>,
    %53 = vector.extract_strided_slice %46 {offsets = [2, 0, 0], sizes = [1, 8, 8], strides = [1, 1, 1]} : vector<4x8x8xf32> to vector<1x8x8xf32>
    %54 = vector.shape_cast %53 : vector<1x8x8xf32> to vector<8x8xf32>
    %c0_19 = arith.constant 0 : index
    %c16 = arith.constant 16 : index
    %55 = vector.load %arg17[%c0_19, %c16] : memref<8x32xf32, #tpu.memory_space<vmem>>, vector<8x8xf32>
    tpu.vector_store %arg17[%c0_19, %c16], %54 {strides = array<i32>} : memref<8x32xf32, #tpu.memory_space<vmem>>, vector<8x8xf32>,
    %56 = vector.extract_strided_slice %46 {offsets = [3, 0, 0], sizes = [1, 8, 8], strides = [1, 1, 1]} : vector<4x8x8xf32> to vector<1x8x8xf32>
    %57 = vector.shape_cast %56 : vector<1x8x8xf32> to vector<8x8xf32>
    %c0_20 = arith.constant 0 : index
    %c24 = arith.constant 24 : index
    %58 = vector.load %arg17[%c0_20, %c24] : memref<8x32xf32, #tpu.memory_space<vmem>>, vector<8x8xf32>
    tpu.vector_store %arg17[%c0_20, %c24], %57 {strides = array<i32>} : memref<8x32xf32, #tpu.memory_space<vmem>>, vector<8x8xf32>,
    %c0_21 = arith.constant 0 : index
    %c0_22 = arith.constant 0 : index
    %59 = vector.load %arg17[%c0_21, %c0_22] : memref<8x32xf32, #tpu.memory_space<vmem>>, vector<8x32xf32>
    %60 = arith.truncf %59 : vector<8x32xf32> to vector<8x32xbf16>
    %c0_23 = arith.constant 0 : index
    %c0_24 = arith.constant 0 : index
    %c0_25 = arith.constant 0 : index
    %61 = vector.load %arg6[%c0_23, %c0_24, %c0_25] : memref<1x32x32xbf16, #tpu.memory_space<vmem>>, vector<1x32x32xbf16>
    %62 = vector.shape_cast %61 : vector<1x32x32xbf16> to vector<32x32xbf16>
    %cst_26 = arith.constant dense<0.000000e+00> : vector<8x32xf32>
    %63 = tpu.matmul %60, %62, %cst_26 {dimension_numbers = #tpu.dot_dimension_numbers<[1], [0], [0], [1], [0, 0, 1, 1], [], []>} : vector<8x32xbf16>, vector<32x32xbf16>, vector<8x32xf32> -> vector<8x32xf32>
    %c0_27 = arith.constant 0 : index
    %c0_28 = arith.constant 0 : index
    %c0_29 = arith.constant 0 : index
    %64 = vector.load %arg7[%c0_27, %c0_28, %c0_29] : memref<1x1x32xf32, #tpu.memory_space<vmem>>, vector<1x1x32xf32>
    %65 = vector.shape_cast %64 : vector<1x1x32xf32> to vector<1x32xf32>
    %66 = vector.broadcast %65 : vector<1x32xf32> to vector<8x32xf32>
    %67 = arith.addf %63, %66 : vector<8x32xf32>
    %68 = arith.addf %4, %67 : vector<8x32xf32>
    %c0_30 = arith.constant 0 : index
    %c0_31 = arith.constant 0 : index
    %c0_32 = arith.constant 0 : index
    %69 = vector.load %arg8[%c0_30, %c0_31, %c0_32] : memref<1x1x32xf32, #tpu.memory_space<vmem>>, vector<1x1x32xf32>
    %70 = vector.shape_cast %69 : vector<1x1x32xf32> to vector<1x32xf32>
    %c0_33 = arith.constant 0 : index
    %c0_34 = arith.constant 0 : index
    %c0_35 = arith.constant 0 : index
    %71 = vector.load %arg9[%c0_33, %c0_34, %c0_35] : memref<1x1x32xf32, #tpu.memory_space<vmem>>, vector<1x1x32xf32>
    %72 = vector.shape_cast %71 : vector<1x1x32xf32> to vector<1x32xf32>
    %cst_36 = arith.constant dense<0.000000e+00> : vector<8xf32>
    %73 = vector.multi_reduction <add>, %68, %cst_36 [1] : vector<8x32xf32> to vector<8xf32>
    %74 = vector.shape_cast %73 : vector<8xf32> to vector<8x1xf32>
    %cst_37 = arith.constant 3.200000e+01 : f32
    %75 = vector.broadcast %cst_37 : f32 to vector<8x1xf32>
    %76 = arith.divf %74, %75 : vector<8x1xf32>
    %77 = vector.broadcast %76 : vector<8x1xf32> to vector<8x32xf32>
    %78 = arith.subf %68, %77 : vector<8x32xf32>
    %79 = arith.mulf %78, %78 : vector<8x32xf32>
    %cst_38 = arith.constant dense<0.000000e+00> : vector<8xf32>
    %80 = vector.multi_reduction <add>, %79, %cst_38 [1] : vector<8x32xf32> to vector<8xf32>
    %81 = vector.shape_cast %80 : vector<8xf32> to vector<8x1xf32>
    %cst_39 = arith.constant 3.200000e+01 : f32
    %82 = vector.broadcast %cst_39 : f32 to vector<8x1xf32>
    %83 = arith.divf %81, %82 : vector<8x1xf32>
    %84 = vector.broadcast %76 : vector<8x1xf32> to vector<8x32xf32>
    %85 = arith.subf %68, %84 : vector<8x32xf32>
    %cst_40 = arith.constant 9.99999974E-6 : f32
    %86 = vector.broadcast %cst_40 : f32 to vector<8x1xf32>
    %87 = arith.addf %83, %86 : vector<8x1xf32>
    %88 = math.rsqrt %87 : vector<8x1xf32>
    %89 = vector.broadcast %88 : vector<8x1xf32> to vector<8x32xf32>
    %90 = arith.mulf %85, %89 : vector<8x32xf32>
    %91 = vector.broadcast %70 : vector<1x32xf32> to vector<8x32xf32>
    %92 = arith.mulf %90, %91 : vector<8x32xf32>
    %93 = vector.broadcast %72 : vector<1x32xf32> to vector<8x32xf32>
    %94 = arith.addf %92, %93 : vector<8x32xf32>
    %95 = arith.truncf %94 : vector<8x32xf32> to vector<8x32xbf16>
    %c0_41 = arith.constant 0 : index
    %c0_42 = arith.constant 0 : index
    %c0_43 = arith.constant 0 : index
    %96 = vector.load %arg10[%c0_41, %c0_42, %c0_43] : memref<1x32x64xbf16, #tpu.memory_space<vmem>>, vector<1x32x64xbf16>
    %97 = vector.shape_cast %96 : vector<1x32x64xbf16> to vector<32x64xbf16>
    %cst_44 = arith.constant dense<0.000000e+00> : vector<8x64xf32>
    %98 = tpu.matmul %95, %97, %cst_44 {dimension_numbers = #tpu.dot_dimension_numbers<[1], [0], [0], [1], [0, 0, 1, 1], [], []>} : vector<8x32xbf16>, vector<32x64xbf16>, vector<8x64xf32> -> vector<8x64xf32>
    %c0_45 = arith.constant 0 : index
    %c0_46 = arith.constant 0 : index
    %c0_47 = arith.constant 0 : index
    %99 = vector.load %arg11[%c0_45, %c0_46, %c0_47] : memref<1x1x64xf32, #tpu.memory_space<vmem>>, vector<1x1x64xf32>
    %100 = vector.shape_cast %99 : vector<1x1x64xf32> to vector<1x64xf32>
    %101 = vector.broadcast %100 : vector<1x64xf32> to vector<8x64xf32>
    %102 = arith.addf %98, %101 : vector<8x64xf32>
    %cst_48 = arith.constant 0.000000e+00 : f32
    %103 = vector.broadcast %cst_48 : f32 to vector<8x64xf32>
    %104 = arith.maximumf %102, %103 : vector<8x64xf32>
    %105 = arith.truncf %104 : vector<8x64xf32> to vector<8x64xbf16>
    %c0_49 = arith.constant 0 : index
    %c0_50 = arith.constant 0 : index
    %c0_51 = arith.constant 0 : index
    %106 = vector.load %arg12[%c0_49, %c0_50, %c0_51] : memref<1x64x32xbf16, #tpu.memory_space<vmem>>, vector<1x64x32xbf16>
    %107 = vector.shape_cast %106 : vector<1x64x32xbf16> to vector<64x32xbf16>
    %cst_52 = arith.constant dense<0.000000e+00> : vector<8x32xf32>
    %108 = tpu.matmul %105, %107, %cst_52 {dimension_numbers = #tpu.dot_dimension_numbers<[1], [0], [0], [1], [0, 0, 1, 1], [], []>} : vector<8x64xbf16>, vector<64x32xbf16>, vector<8x32xf32> -> vector<8x32xf32>
    %c0_53 = arith.constant 0 : index
    %c0_54 = arith.constant 0 : index
    %c0_55 = arith.constant 0 : index
    %109 = vector.load %arg13[%c0_53, %c0_54, %c0_55] : memref<1x1x32xf32, #tpu.memory_space<vmem>>, vector<1x1x32xf32>
    %110 = vector.shape_cast %109 : vector<1x1x32xf32> to vector<1x32xf32>
    %111 = vector.broadcast %110 : vector<1x32xf32> to vector<8x32xf32>
    %112 = arith.addf %108, %111 : vector<8x32xf32>
    %113 = arith.addf %94, %112 : vector<8x32xf32>
    %c0_56 = arith.constant 0 : index
    %c0_57 = arith.constant 0 : index
    %c0_58 = arith.constant 0 : index
    %114 = vector.load %arg14[%c0_56, %c0_57, %c0_58] : memref<1x1x32xf32, #tpu.memory_space<vmem>>, vector<1x1x32xf32>
    %115 = vector.shape_cast %114 : vector<1x1x32xf32> to vector<1x32xf32>
    %c0_59 = arith.constant 0 : index
    %c0_60 = arith.constant 0 : index
    %c0_61 = arith.constant 0 : index
    %116 = vector.load %arg15[%c0_59, %c0_60, %c0_61] : memref<1x1x32xf32, #tpu.memory_space<vmem>>, vector<1x1x32xf32>
    %117 = vector.shape_cast %116 : vector<1x1x32xf32> to vector<1x32xf32>
    %cst_62 = arith.constant dense<0.000000e+00> : vector<8xf32>
    %118 = vector.multi_reduction <add>, %113, %cst_62 [1] : vector<8x32xf32> to vector<8xf32>
    %119 = vector.shape_cast %118 : vector<8xf32> to vector<8x1xf32>
    %cst_63 = arith.constant 3.200000e+01 : f32
    %120 = vector.broadcast %cst_63 : f32 to vector<8x1xf32>
    %121 = arith.divf %119, %120 : vector<8x1xf32>
    %122 = vector.broadcast %121 : vector<8x1xf32> to vector<8x32xf32>
    %123 = arith.subf %113, %122 : vector<8x32xf32>
    %124 = arith.mulf %123, %123 : vector<8x32xf32>
    %cst_64 = arith.constant dense<0.000000e+00> : vector<8xf32>
    %125 = vector.multi_reduction <add>, %124, %cst_64 [1] : vector<8x32xf32> to vector<8xf32>
    %126 = vector.shape_cast %125 : vector<8xf32> to vector<8x1xf32>
    %cst_65 = arith.constant 3.200000e+01 : f32
    %127 = vector.broadcast %cst_65 : f32 to vector<8x1xf32>
    %128 = arith.divf %126, %127 : vector<8x1xf32>
    %129 = vector.broadcast %121 : vector<8x1xf32> to vector<8x32xf32>
    %130 = arith.subf %113, %129 : vector<8x32xf32>
    %cst_66 = arith.constant 9.99999974E-6 : f32
    %131 = vector.broadcast %cst_66 : f32 to vector<8x1xf32>
    %132 = arith.addf %128, %131 : vector<8x1xf32>
    %133 = math.rsqrt %132 : vector<8x1xf32>
    %134 = vector.broadcast %133 : vector<8x1xf32> to vector<8x32xf32>
    %135 = arith.mulf %130, %134 : vector<8x32xf32>
    %136 = vector.broadcast %115 : vector<1x32xf32> to vector<8x32xf32>
    %137 = arith.mulf %135, %136 : vector<8x32xf32>
    %138 = vector.broadcast %117 : vector<1x32xf32> to vector<8x32xf32>
    %139 = arith.addf %137, %138 : vector<8x32xf32>
    %140 = vector.shape_cast %139 : vector<8x32xf32> to vector<1x8x32xf32>
    %c0_67 = arith.constant 0 : index
    %c0_68 = arith.constant 0 : index
    %c0_69 = arith.constant 0 : index
    %141 = vector.load %arg16[%c0_67, %c0_68, %c0_69] : memref<1x8x32xf32, #tpu.memory_space<vmem>>, vector<1x8x32xf32>
    tpu.vector_store %arg16[%c0_67, %c0_68, %c0_69], %140 {strides = array<i32>} : memref<1x8x32xf32, #tpu.memory_space<vmem>>, vector<1x8x32xf32>,
    return
  }
  func.func @transform_0(%arg0: i32, %arg1: i32) -> (i32, i32, i32) {
    %c0_i32 = arith.constant 0 : i32
    %c0_i32_0 = arith.constant 0 : i32
    %c0_i32_1 = arith.constant 0 : i32
    return %arg0, %c0_i32, %c0_i32_0 : i32, i32, i32
  }
  func.func @transform_1(%arg0: i32, %arg1: i32) -> (i32, i32, i32) {
    %c0_i32 = arith.constant 0 : i32
    %c0_i32_0 = arith.constant 0 : i32
    %c0_i32_1 = arith.constant 0 : i32
    return %arg0, %c0_i32, %c0_i32_0 : i32, i32, i32
  }
  func.func @transform_2(%arg0: i32, %arg1: i32) -> (i32, i32, i32) {
    %c0_i32 = arith.constant 0 : i32
    %c0_i32_0 = arith.constant 0 : i32
    %c0_i32_1 = arith.constant 0 : i32
    return %arg1, %c0_i32, %c0_i32_0 : i32, i32, i32
  }
  func.func @transform_3(%arg0: i32, %arg1: i32) -> (i32, i32, i32) {
    %c0_i32 = arith.constant 0 : i32
    %c0_i32_0 = arith.constant 0 : i32
    %c0_i32_1 = arith.constant 0 : i32
    return %arg1, %c0_i32, %c0_i32_0 : i32, i32, i32
  }
  func.func @transform_4(%arg0: i32, %arg1: i32) -> (i32, i32, i32) {
    %c0_i32 = arith.constant 0 : i32
    %c0_i32_0 = arith.constant 0 : i32
    %c0_i32_1 = arith.constant 0 : i32
    return %arg1, %c0_i32, %c0_i32_0 : i32, i32, i32
  }
  func.func @transform_5(%arg0: i32, %arg1: i32) -> (i32, i32, i32) {
    %c0_i32 = arith.constant 0 : i32
    %c0_i32_0 = arith.constant 0 : i32
    %c0_i32_1 = arith.constant 0 : i32
    return %arg1, %c0_i32, %c0_i32_0 : i32, i32, i32
  }
  func.func @transform_6(%arg0: i32, %arg1: i32) -> (i32, i32, i32) {
    %c0_i32 = arith.constant 0 : i32
    %c0_i32_0 = arith.constant 0 : i32
    %c0_i32_1 = arith.constant 0 : i32
    return %arg1, %c0_i32, %c0_i32_0 : i32, i32, i32
  }
  func.func @transform_7(%arg0: i32, %arg1: i32) -> (i32, i32, i32) {
    %c0_i32 = arith.constant 0 : i32
    %c0_i32_0 = arith.constant 0 : i32
    %c0_i32_1 = arith.constant 0 : i32
    return %arg1, %c0_i32, %c0_i32_0 : i32, i32, i32
  }
  func.func @transform_8(%arg0: i32, %arg1: i32) -> (i32, i32, i32) {
    %c0_i32 = arith.constant 0 : i32
    %c0_i32_0 = arith.constant 0 : i32
    %c0_i32_1 = arith.constant 0 : i32
    return %arg1, %c0_i32, %c0_i32_0 : i32, i32, i32
  }
  func.func @transform_9(%arg0: i32, %arg1: i32) -> (i32, i32, i32) {
    %c0_i32 = arith.constant 0 : i32
    %c0_i32_0 = arith.constant 0 : i32
    %c0_i32_1 = arith.constant 0 : i32
    return %arg1, %c0_i32, %c0_i32_0 : i32, i32, i32
  }
  func.func @transform_10(%arg0: i32, %arg1: i32) -> (i32, i32, i32) {
    %c0_i32 = arith.constant 0 : i32
    %c0_i32_0 = arith.constant 0 : i32
    %c0_i32_1 = arith.constant 0 : i32
    return %arg1, %c0_i32, %c0_i32_0 : i32, i32, i32
  }
  func.func @transform_11(%arg0: i32, %arg1: i32) -> (i32, i32, i32) {
    %c0_i32 = arith.constant 0 : i32
    %c0_i32_0 = arith.constant 0 : i32
    %c0_i32_1 = arith.constant 0 : i32
    return %arg1, %c0_i32, %c0_i32_0 : i32, i32, i32
  }
  func.func @transform_12(%arg0: i32, %arg1: i32) -> (i32, i32, i32) {
    %c0_i32 = arith.constant 0 : i32
    %c0_i32_0 = arith.constant 0 : i32
    %c0_i32_1 = arith.constant 0 : i32
    return %arg1, %c0_i32, %c0_i32_0 : i32, i32, i32
  }
  func.func @transform_13(%arg0: i32, %arg1: i32) -> (i32, i32, i32) {
    %c0_i32 = arith.constant 0 : i32
    %c0_i32_0 = arith.constant 0 : i32
    %c0_i32_1 = arith.constant 0 : i32
    return %arg1, %c0_i32, %c0_i32_0 : i32, i32, i32
  }
  func.func @transform_14(%arg0: i32, %arg1: i32) -> (i32, i32, i32) {
    %c0_i32 = arith.constant 0 : i32
    %c0_i32_0 = arith.constant 0 : i32
    %c0_i32_1 = arith.constant 0 : i32
    return %arg0, %c0_i32, %c0_i32_0 : i32, i32, i32
  }
}

</mosaic_0001>

<bundles_post_ra>
// kernel: local_road_env_encoder.2
= control target key start
LH: loop header
LB: loop body
LE: loop exit
PB: predicated region body
PF: predicated region fallthrough
CT: control target
= control target key end

     0   :  { %10 = vsyncpa [#allocation3], 0  ;;  %s655_s0 = inlined_call_operand.vmem [shape: s32[16,1], index: 0, kind: input, shape index: {}]   ;;  %s656_s1 = inlined_call_operand.vmem [shape: f32[16,2], index: 1, kind: input, shape index: {}]   ;;  %s657_s2 = inlined_call_operand.vmem [shape: f32[11,32], index: 2, kind: input, shape index: {}]   ;;  %s658_s3 = inlined_call_operand.vmem [shape: f32[2,32], index: 3, kind: input, shape index: {}]   ;;  %s659_s4 = inlined_call_operand.vmem [shape: f32[1,32], index: 4, kind: input, shape index: {}]   ;;  %s660_s5 = inlined_call_operand.hbm [shape: f32[16,32], index: 5, kind: output, shape index: {}]  }
   0x1   :  { %12 = vsyncpa [#allocation3 + $0x1], 0  ;;  %s555_s18 = smov 0   ;;  %s557_s19 = smov 0  }
   0x2   :  { %s559_s20 = smov 0   ;;  %s561_s21 = smov 0  }
   0x3 LB: > { %s576_s22 = sadd.s32 4294967295, %s521_s21   ;;  %s400_s23 = sadd.s32 4294967294, %s521_s21   ;;  %s521_s21 = sphi %s561_s21, %s666_s21   ;;  %s517_s20 = sphi %s559_s20, %s665_s20   ;;  %s513_s19 = sphi %s557_s19, %s664_s19   ;;  %s509_s18 = sphi %s555_s18, %s663_s18  }
   0x4   : > { %s580_s24 = sadd.s32 1, %s521_s21   ;;  %s140_s25 = sadd.s32 1, %s517_s20 }
   0x5   : > { %s137_s26 = ssub.s32 %s521_s21, %s580_s24  ;;  %p150_p0 = scmp.ne.s32.totalorder %s517_s20, %s513_s19 }
   0x6   : > { %p138_p1 = scmp.eq.s32.totalorder %s137_s26, 0  ;;  %p151_p2 = scmp.eq.s32.totalorder %s576_s22, 1 }
   0x7   : > { %p156_p3 = scmp.ne.s32.totalorder %s513_s19, %s509_s18  ;;  %p157_p4 = scmp.eq.s32.totalorder %s400_s23, 1 }
   0x8   : > { %s591_s27 = scalar_select %p138_p1, %s517_s20, %s140_s25  }
   0x9   : > { %p593_p5 = por %p151_p2, %p150_p0  ;;  %p597_p6 = por %p157_p4, %p156_p3 }
   0xa   : > { %p403_p7 = scmp.ge.s32.totalorder %s521_s21, 1  ;;  %p198_p8 = scmp.lt.s32.totalorder %s521_s21, 3 }
   0xc   : > { %p199_p9 = pnand %p403_p7, %p198_p8 }
   0xd   : > { %p229_p10 = scmp.lt.s32.totalorder (!%p199_p9), %s576_s22, 1  ;;  %s226_s25 = sand.u32 (!%p199_p9), 1, %s513_s19  }
   0xe   : > { %202 = sbr.rel (%p199_p9) target bundleno = 274 (0x112), region = 40  ;;  %s404_s26 = sshll.u32 (!%p199_p9), %s226_s25, 3 }
   0xf   : > { %s413_s30 = sshll.u32 (!%p199_p9), %s576_s22, 3  ;;  %s479_s23 = scalar_lea.hbm (!%p199_p9), %s660_s5, 16 }
  0x13   : > { %v247_v0 = vld [vmem:[%s657_s2 + $0x8] sm:$0x7]  ;;  %vm282_vm0 = vcmask 1042432   ;;  %v523_v1 = vmov 0   ;;  %s230_s7 = scalar_select %p229_p10, %s576_s22, 1  ;;  %vm254_vm1 = vcmask 1041408   ;;  %v238_v6 = vlaneseq }
  0x14   : > { %457 = vset.pattern.permute.xlu0 %v523_v1  ;;  %410 = vmatpush.msk.msra.mxu1 %vm282_vm0, %v247_v0  ;;  %v249_v3 = vld [vmem:[%s658_s3] sm:$0x3]  ;;  %vm250_vm2 = vcmask 15360   ;;  %vm278_vm3 = vcmask 89088   ;;  %v524_v9 = vmov 0.0   ;;  %vm311_vm5 = vcmask 261120  }
  0x15   : > { %s405_s8 = sshll.u32 %s230_s7, 3  ;;  %v246_v4 = vld [vmem:[%s657_s2] sm:$0xff]  ;;  %408 = vmatpush.msk.msra.mxu0 %vm254_vm1, %v249_v3  ;;  %v239_v7 = vand.u32 127, %v238_v6  ;;  %s314_s22 = scalar_lea.sflag [#allocation3], %s226_s25 }
  0x16   : > { %s232_s11 = scalar_lea.vmem %s655_s0, %s405_s8  ;;  %s236_s14 = scalar_lea.vmem %s656_s1, %s405_s8  ;;  %301 = vmatpush.msra.mxu1 %v246_v4  ;;  %v458_v12 = vld [vmem:[%s659_s4] ss:$0 sm:$0xff] }
  0x17   : > { %v237_v2 = vld [vmem:[%s232_s11] sm:$0xff]  ;;  %s324_s8 = scalar_lea.hbm %s660_s5, %s413_s30  ;;  %s228_s11 = scalar_lea.vmem [#allocation2], %s404_s26 }
  0x18   : > { %241 = vperm.xlu0 %457, %v237_v2   ;;  %v248_v5 = vld [vmem:[%s236_s14] sm:$0xff]  ;;  %s326_s12 = sshll.u32 %s228_s11, 4  ;;  %s328_s13 = sshll.u32 %s324_s8, 4  ;;  %s327_s12 = int_to_ptr.vmem [resolvable:$true] %s326_s12  ;;  %s329_s13 = int_to_ptr.hbm [resolvable:$true] %s328_s13 }
  0x19   : > { %409 = vmatmul.msk.f32.vlgmr.msra.gmra.mxu0 %vm250_vm2, %v248_v5  ;;  %s473_s14 = sshra.s32 %s329_s13, 4  ;;  %s474_s14 = int_to_ptr.hbm [resolvable:$true] %s473_s14 }
  0x1a   : > { %s475_s15 = scalar_lea.hbm %s474_s14, 8  ;;  %p480_p0 = scmp.lt.s32.totalorder %s474_s14, %s660_s5 }
  0x1b   : > { %p476_p11 = scmp.ne.s32.totalorder %s474_s14, %s475_s15  ;;  %p481_p1 = scmp.lt.s32.totalorder %s479_s23, %s475_s15 }
  0x1d   : > { %p477_p12 = pnand %p476_p11, %p593_p5  ;;  %p482_p2 = por %p481_p1, %p480_p0 }
  0x1f   : > { %p478_p13 = pneg %p477_p12 }
  0x21   : > { %p483_p3 = pnand %p482_p2, %p478_p13 }
  0x8a   : > { %v242_v8 = vpop.permute.xlu0 %241 }
  0x8b   : > { %vm243_vm4 = vcmp.eq.s32.totalorder %v242_v8, %v239_v7 }
  0x8c   : > { %v407_v10 = vsel %vm243_vm4, 1.0, %v524_v9 }
  0x8d   : > { %411 = vmatmul.msk.f32.vlgmr.msra.gmra.mxu1 %vm278_vm3, %v407_v10 }
  0x96   : > { %v275_v11 = vpop.f32.mrf.mxu0 }
 0x10a   : > { %v303_v13 = vpop.f32.mrf.mxu1 }
 0x10b   : > { %v304_v14 = vadd.f32 %v303_v13, %v275_v11 }
 0x10d   : > { %v310_v15 = vadd.f32 %v458_v12, %v304_v14 }
 0x10f   : > { %312 = vst.msk [vmem:[%s228_s11] sm:$0xff] %vm311_vm5, %v310_v15 }
 0x110   : > { %486 = shalt.err (!%p483_p3)
}
 0x111   : > { %416 = dma.vmem_to_hbm [thread:$0]  (%p593_p5), %s327_s12, 128, %s329_s13, %s314_s22  }
 0x112 PF: > { %p422_p4 = scmp.ge.s32.totalorder %s521_s21, 2  ;;  %s340_s25 = sand.u32 1, %s509_s18  }
 0x113   : > { %s341_s6 = scalar_lea.sflag [#allocation3], %s340_s25 }
 0x114   : > { %p419_p7 = pnand %p422_p4, %p597_p6 }
 0x116   : > { %p420_p8 = pneg %p419_p7 }
 0x118   : > { %504 = dma.done.wait (%p420_p8), %s341_s6, 128  }
 0x119   : > { %506 = vsyncadd (%p420_p8), %s341_s6, 4294967168  ;;  %p15_p9 = scmp.ge.s32.totalorder %s580_s24, 4   ;;  %s663_s18 = smov %s513_s19 }
 0x11a   : > { %s664_s19 = smov %s517_s20  ;;  %s665_s20 = smov %s591_s27 }
 0x11b   : > { %s666_s21 = smov %s580_s24  ;;  %17 = sbr.rel (!%p15_p9) target bundleno = 3 (0x3), region = 78 }
 0x120   :  { %347 = vsyncpa [#allocation3], 1 }
 0x121   :  { %349 = vsyncpa [#allocation3 + $0x1], 1 }

// kernel: local_road_env_encoder.3
= control target key start
LH: loop header
LB: loop body
LE: loop exit
PB: predicated region body
PF: predicated region fallthrough
CT: control target
= control target key end

     0   :  { %s2658_s0 = inlined_call_operand.vmem [shape: f32[2,1,8], index: 0, kind: input, shape index: {}]   ;;  %s2659_s1 = inlined_call_operand.hbm [shape: f32[2,8,32], index: 1, kind: input, shape index: {}, may-alias: {1,14}]   ;;  %s2660_s2 = inlined_call_operand.vmem [shape: bf16[2,32,96], index: 2, kind: input, shape index: {}]   ;;  %s2661_s3 = inlined_call_operand.vmem [shape: f32[2,1,96], index: 3, kind: input, shape index: {}]   ;;  %s2662_s4 = inlined_call_operand.vmem [shape: bf16[2,32,32], index: 4, kind: input, shape index: {}]   ;;  %s2663_s5 = inlined_call_operand.vmem [shape: f32[2,1,32], index: 5, kind: input, shape index: {}]   ;;  %s2664_s6 = inlined_call_operand.vmem [shape: f32[2,1,32], index: 6, kind: input, shape index: {}]   ;;  %s2665_s7 = inlined_call_operand.hbm [shape: f32[2,1,32], index: 7, kind: input, shape index: {}]   ;;  %s2666_s8 = inlined_call_operand.vmem [shape: bf16[2,32,64], index: 8, kind: input, shape index: {}]   ;;  %s2667_s9 = inlined_call_operand.hbm [shape: f32[2,1,64], index: 9, kind: input, shape index: {}]   ;;  %s2668_s10 = inlined_call_operand.vmem [shape: bf16[2,64,32], index: 10, kind: input, shape index: {}]   ;;  %s2669_s11 = inlined_call_operand.hbm [shape: f32[2,1,32], index: 11, kind: input, shape index: {}]   ;;  %s2670_s12 = inlined_call_operand.hbm [shape: f32[2,1,32], index: 12, kind: input, shape index: {}]   ;;  %s2671_s13 = inlined_call_operand.hbm [shape: f32[2,1,32], index: 13, kind: input, shape index: {}]   ;;  %s2672_s14 = inlined_call_operand.hbm [shape: f32[2,8,32], index: 14, kind: output, shape index: {}, may-alias: {1,14}]  }
   0x1   :  { %2690 = sst [smem:[#allocation35_spill]] %s2658_s0 }
   0x2   :  { %2691 = sst [smem:[#allocation36_spill]] %s2659_s1 }
   0x3   :  { %2692 = sst [smem:[#allocation37_spill]] %s2660_s2 }
   0x4   :  { %2693 = sst [smem:[#allocation38_spill]] %s2661_s3 }
   0x5   :  { %2694 = sst [smem:[#allocation39_spill]] %s2662_s4 }
   0x6   :  { %2695 = sst [smem:[#allocation40_spill]] %s2663_s5 }
   0x7   :  { %2696 = sst [smem:[#allocation41_spill]] %s2664_s6 }
   0x8   :  { %2697 = sst [smem:[#allocation42_spill]] %s2665_s7 }
   0x9   :  { %2698 = sst [smem:[#allocation43_spill]] %s2666_s8 }
   0xa   :  { %2699 = sst [smem:[#allocation44_spill]] %s2667_s9 }
   0xb   :  { %2700 = sst [smem:[#allocation45_spill]] %s2668_s10 }
   0xc   :  { %2701 = sst [smem:[#allocation46_spill]] %s2669_s11 }
   0xd   :  { %2702 = sst [smem:[#allocation47_spill]] %s2670_s12 }
   0xe   :  { %2703 = sst [smem:[#allocation48_spill]] %s2671_s13 }
   0xf   :  { %2704 = sst [smem:[#allocation49_spill]] %s2672_s14 }
  0x10   :  { %19 = vsyncpa [#allocation4], 0 }
  0x11   :  { %21 = vsyncpa [#allocation4 + $0x1], 0 }
  0x12   :  { %22 = vsyncpa [#allocation7], 0 }
  0x13   :  { %24 = vsyncpa [#allocation7 + $0x1], 0 }
  0x14   :  { %25 = vsyncpa [#allocation10], 0 }
  0x15   :  { %27 = vsyncpa [#allocation10 + $0x1], 0 }
  0x16   :  { %28 = vsyncpa [#allocation13], 0 }
  0x17   :  { %30 = vsyncpa [#allocation13 + $0x1], 0 }
  0x18   :  { %31 = vsyncpa [#allocation5], 0 }
  0x19   :  { %33 = vsyncpa [#allocation5 + $0x1], 0  ;;  %s2235_s29 = smov 0   ;;  %s2237_s30 = smov 0  }
  0x1a   :  { %s2239_s15 = smov 0   ;;  %s2241_s16 = smov 0  }
  0x1b   :  { %s2243_s17 = smov 0   ;;  %s2245_s18 = smov 0  }
  0x1c   :  { %s2247_s19 = smov 0   ;;  %s2249_s20 = smov 0  }
  0x1d   :  { %s2251_s21 = smov 0   ;;  %s2253_s22 = smov 0  }
  0x1e   :  { %s2255_s23 = smov 0  }
  0x1f LB: > { %2705 = sst [smem:[#allocation20_spill]] %s2113_s30  ;;  %p92_p0 = scmp.eq.s32.totalorder %s2149_s23, 0  ;;  %s2149_s23 = sphi %s2255_s23, %s39_s23   ;;  %s2145_s22 = sphi %s2253_s22, %s2769_s22   ;;  %s2141_s21 = sphi %s2251_s21, %s2768_s21   ;;  %s2137_s20 = sphi %s2249_s20, %s2767_s20   ;;  %s2133_s19 = sphi %s2247_s19, %s2766_s19   ;;  %s2129_s18 = sphi %s2245_s18, %s2765_s18   ;;  %s2125_s17 = sphi %s2243_s17, %s2764_s17   ;;  %s2121_s16 = sphi %s2241_s16, %s2763_s16   ;;  %s2117_s15 = sphi %s2239_s15, %s2762_s15   ;;  %s2113_s30 = sphi %s2237_s30, %s2761_s30   ;;  %s2109_s29 = sphi %s2235_s29, %s2760_s29  }
  0x20   : > { %2706 = sst [smem:[#allocation21_spill]] %s2117_s15  ;;  %p247_p1 = scmp.ne.s32.totalorder %s2117_s15, %s2113_s30 }
  0x21   : > { %2707 = sst [smem:[#allocation22_spill]] %s2121_s16  ;;  %p2676_p2 = scmp.lt.s32.totalorder %s2149_s23, 4 }
  0x22   : > { %2708 = sst [smem:[#allocation23_spill]] %s2125_s17  ;;  %s518_s25 = sand.u32 1, %s2149_s23  }
  0x23   : > { %2709 = sst [smem:[#allocation24_spill]] %s2129_s18  ;;  %p249_p3 = por %p247_p1, %p92_p0 }
  0x24   : > { %2710 = sst [smem:[#allocation25_spill]] %s2133_s19  ;;  %s2299_s26 = sand.u32 1, %s2117_s15  }
  0x25   : > { %2711 = sst [smem:[#allocation26_spill]] %s2137_s20  ;;  %s521_s8 = scalar_lea.vmem [#allocation6], %s2299_s26 }
  0x26   : > { %2712 = sst [smem:[#allocation27_spill]] %s2141_s21  ;;  %s528_s6 = sshll.u32 %s521_s8, 4  ;;  %s529_s6 = int_to_ptr.vmem [resolvable:$true] %s528_s6 }
  0x27   : > { %2713 = sst [smem:[#allocation28_spill]] %s2145_s22  ;;  %p2308_p4 = pnand %p2676_p2, %p249_p3 }
  0x28   : > { %s2714_s7 = sld [smem:[#allocation42_spill]]  ;;  %p1586_p5 = scmp.ge.s32.totalorder %s2149_s23, 1 }
  0x29   : > { %p617_p6 = scmp.lt.s32.totalorder %s2149_s23, 5  ;;  %s2314_s27 = scalar_lea.sflag [#allocation7], %s518_s25 }
  0x2a   : > { %s2717_s11 = sld [smem:[#allocation46_spill]]  ;;  %s571_s5 = scalar_lea.vmem [#allocation9], %s2299_s26 }
  0x2b   : > { %p2319_p7 = pnand %p1586_p5, %p617_p6  ;;  %s578_s4 = sshll.u32 %s571_s5, 4  ;;  %s579_s4 = int_to_ptr.vmem [resolvable:$true] %s578_s4 }
  0x2c   : > { %s48_s5 = sadd.s32 1, %s2141_s21  ;;  %s84_s28 = sadd.s32 1, %s2129_s18 }
  0x2d   : > { %p49_p8 = scmp.ge.s32.totalorder %s48_s5, 2  ;;  %p91_p9 = scmp.ne.s32.totalorder %s2129_s18, %s2125_s17 }
  0x2e   : > { %s524_s14 = scalar_lea.hbm %s2714_s7, %s2141_s21  ;;  %p97_p11 = scmp.ne.s32.totalorder %s2125_s17, %s2121_s16 }
  0x2f   : > { %s526_s10 = sshll.u32 %s524_s14, 4  ;;  %s1581_s14 = sadd.s32 4294967294, %s2149_s23   ;;  %s527_s10 = int_to_ptr.hbm [resolvable:$true] %s526_s10 }
  0x30   : > { %1688 = dma.hbm_to_vmem [thread:$0]  (!%p2308_p4), %s527_s10, 16, %s529_s6, %s2314_s27  }
  0x31   : > { %s574_s7 = scalar_lea.hbm %s2717_s11, %s2141_s21  ;;  %s2328_s6 = scalar_lea.sflag [#allocation10], %s518_s25 }
  0x32   : > { %s576_s2 = sshll.u32 %s574_s7, 4  ;;  %s2334_s10 = sadd.s32 4294967295, %s2149_s23   ;;  %s577_s2 = int_to_ptr.hbm [resolvable:$true] %s576_s2 }
  0x33   : > { %1694 = dma.hbm_to_vmem [thread:$0]  (!%p2308_p4), %s577_s2, 16, %s579_s4, %s2328_s6  }
  0x34   : > { %s51_s7 = sadd.s32 1, %s2145_s22  ;;  %s2771_s5 = smov (%p49_p8, %s48_s5), 0 }
  0x35   : > { %2718 = sst [smem:[#allocation29_spill]] %s2771_s5  ;;  %s2773_s7 = smov (!%p49_p8, %s51_s7), %s2145_s22 }
  0x36   : > { %p2350_p10 = por %p92_p0, %p91_p9  ;;  %p53_p12 = scmp.ge.s32.totalorder %s2773_s7, 2 }
  0x37   : > { %p98_p13 = scmp.eq.s32.totalorder %s2334_s10, 0  ;;  %s237_s4 = ssub.s32 %s2141_s21, %s2771_s5 }
  0x38   : > { %p253_p1 = scmp.ne.s32.totalorder %s2113_s30, %s2109_s29  ;;  %s2775_s7 = smov (%p53_p12, %s2773_s7), 0 }
  0x39   : > { %2720 = sst [smem:[#allocation30_spill]] %s2775_s7  ;;  %p2366_p3 = por %p98_p13, %p97_p11 }
  0x3a   : > { %p238_p0 = scmp.eq.s32.totalorder %s237_s4, 0  ;;  %s81_s11 = ssub.s32 %s2145_s22, %s2775_s7 }
  0x3b   : > { %p2372_p5 = por %p253_p1, %p98_p13  ;;  %p82_p6 = scmp.eq.s32.totalorder %s81_s11, 0 }
  0x3c   : > { %p433_p8 = scmp.eq.s32.totalorder %s2334_s10, 3  ;;  %s2724_s5 = sadd.s32 1, %s2117_s15 }
  0x3d   : > { %s2722_s3 = scalar_select %p2372_p5, 1, 0 }
  0x3e   : > { %s2380_s29 = scalar_select %p238_p0, %s2117_s15, %s2724_s5  }
  0x3f   : > { %2723 = sst [smem:[#allocation31_spill]] %s2722_s3  ;;  %p2388_p12 = por %p433_p8, %p91_p9 }
  0x40   : > { %2725 = sst [smem:[#allocation32_spill]] %s2380_s29  ;;  %p439_p2 = scmp.eq.s32.totalorder %s1581_s14, 3 }
  0x41   : > { %s2383_s0 = scalar_select %p82_p6, %s2129_s18, %s84_s28  }
  0x42   : > { %s465_s4 = sand.u32 1, %s2129_s18   ;;  %s1585_s7 = sshll.u32 %s2145_s22, 3 }
  0x43   : > { %2726 = sst [smem:[#allocation33_spill]] %s2383_s0  ;;  %p2397_p13 = por %p439_p2, %p97_p11 }
  0x44   : > { %s1584_s20 = sshll.u32 %s465_s4, 3  ;;  %s2730_s1 = sld [smem:[#allocation36_spill]] }
  0x45   : > { %s2728_s11 = scalar_select %p2397_p13, 1, 0 }
  0x46   : > { %s469_s14 = scalar_lea.vmem [#allocation3], %s1584_s20  ;;  %p2731_p9 = scmp.lt.s32.totalorder %s2149_s23, 4 }
  0x47   : > { %2729 = sst [smem:[#allocation34_spill]] %s2728_s11  ;;  %s477_s18 = sshll.u32 %s469_s14, 4  ;;  %s478_s18 = int_to_ptr.vmem [resolvable:$true] %s477_s18 }
  0x48   : > { %p1683_p2 = pnand %p2731_p9, %p2350_p10  ;;  %s2732_s9 = sld [smem:[#allocation44_spill]] }
  0x49   : > { %s466_s5 = scalar_lea.sflag [#allocation4], %s465_s4  ;;  %s2733_s12 = sld [smem:[#allocation47_spill]] }
  0x4a   : > { %s473_s28 = scalar_lea.hbm %s2730_s1, %s1585_s7  ;;  %s546_s7 = scalar_lea.vmem [#allocation8], %s2299_s26 }
  0x4b   : > { %s475_s0 = sshll.u32 %s473_s28, 4  ;;  %s553_s28 = sshll.u32 %s546_s7, 4  ;;  %s476_s0 = int_to_ptr.hbm [resolvable:$true] %s475_s0  ;;  %s554_s28 = int_to_ptr.vmem [resolvable:$true] %s553_s28 }
  0x4c   : > { %1685 = dma.hbm_to_vmem [thread:$0]  (!%p1683_p2), %s476_s0, 128, %s478_s18, %s466_s5  }
  0x4d   : > { %s588_s29 = scalar_lea.vmem [#allocation11], %s2299_s26  ;;  %s2734_s13 = sld [smem:[#allocation48_spill]] }
  0x4e   : > { %s549_s15 = scalar_lea.hbm %s2732_s9, %s2141_s21  ;;  %s595_s14 = sshll.u32 %s588_s29, 4  ;;  %s596_s14 = int_to_ptr.vmem [resolvable:$true] %s595_s14 }
  0x4f   : > { %s551_s3 = sshll.u32 %s549_s15, 4  ;;  %s591_s22 = scalar_lea.hbm %s2733_s12, %s2141_s21  ;;  %s552_s3 = int_to_ptr.hbm [resolvable:$true] %s551_s3 }
  0x50   : > { %1691 = dma.hbm_to_vmem [thread:$0]  (!%p2308_p4), %s552_s3, 16, %s554_s28, %s2314_s27  }
  0x51   : > { %s593_s1 = sshll.u32 %s591_s22, 4  ;;  %s605_s5 = scalar_lea.vmem [#allocation12], %s2299_s26  ;;  %s594_s1 = int_to_ptr.hbm [resolvable:$true] %s593_s1 }
  0x52   : > { %1697 = dma.hbm_to_vmem [thread:$0]  (!%p2308_p4), %s594_s1, 16, %s596_s14, %s2328_s6  }
  0x53   : > { %s608_s18 = scalar_lea.hbm %s2734_s13, %s2141_s21  ;;  %s612_s7 = sshll.u32 %s605_s5, 4  ;;  %s613_s7 = int_to_ptr.vmem [resolvable:$true] %s612_s7 }
  0x54   : > { %s610_s4 = sshll.u32 %s608_s18, 4  ;;  %s603_s27 = scalar_lea.sflag [#allocation13], %s2299_s26  ;;  %s611_s4 = int_to_ptr.hbm [resolvable:$true] %s610_s4 }
  0x55   : > { %1700 = dma.hbm_to_vmem [thread:$0]  (!%p2308_p4), %s611_s4, 16, %s613_s7, %s603_s27  }
  0x56   : > { %621 = sbr.rel (%p2319_p7) target bundleno = 2096 (0x830), region = 76  ;;  %s2435_s3 = sand.u32 (!%p2319_p7), 1, %s2125_s17  }
  0x57   : > { %s2684_s1 = sshll.u32 (!%p2319_p7), %s2435_s3, 3  ;;  %s624_s6 = scalar_lea.sflag (!%p2319_p7), [#allocation4], %s2435_s3 }
  0x58   : > { %s2441_s28 = scalar_lea.vmem (!%p2319_p7), [#allocation3], %s2684_s1 }
  0x5b   : > { %2088 = dma.done.wait (%p2366_p3), %s624_s6, 128  }
  0x5c   : > { %2090 = vsyncadd (%p2366_p3), %s624_s6, 4294967168  ;;  %s633_s26 = sand.u32 1, %s2334_s10   ;;  %s2449_s8 = sand.u32 1, %s2113_s30  }
  0x5d   : > { %s634_s20 = scalar_lea.sflag [#allocation7], %s633_s26 }
  0x5e   : > { %2092 = dma.done.wait (%p2372_p5), %s634_s20, 32  }
  0x5f   : > { %2094 = vsyncadd (%p2372_p5), %s634_s20, 4294967264  ;;  %s652_s25 = scalar_lea.sflag [#allocation10], %s633_s26 }
  0x60   : > { %2096 = dma.done.wait (%p2372_p5), %s652_s25, 32  }
  0x61   : > { %2098 = vsyncadd (%p2372_p5), %s652_s25, 4294967264  ;;  %s670_s14 = scalar_lea.sflag [#allocation13], %s2449_s8 }
  0x62   : > { %2100 = dma.done.wait (%p2372_p5), %s670_s14, 16  }
  0x63   : > { %2102 = vsyncadd (%p2372_p5), %s670_s14, 4294967280  ;;  %s2736_s15 = sld [smem:[#allocation26_spill]] }
  0x64   : > { %s2737_s18 = sld [smem:[#allocation25_spill]] }
  0x65   : > { %s2739_s25 = sld [smem:[#allocation38_spill]] }
  0x66   : > { %s2740_s29 = sld [smem:[#allocation37_spill]] }
  0x67   : > { %s2741_s9 = sld [smem:[#allocation39_spill]] }
  0x68   : > { %s2742_s13 = sld [smem:[#allocation40_spill]] }
  0x69   : > { %p770_p4 = scmp.lt.s32.totalorder %s2736_s15, 1  ;;  %s2743_s6 = sld [smem:[#allocation41_spill]] }
  0x6a   : > { %p773_p7 = scmp.lt.s32.totalorder %s2737_s18, 1  ;;  %s2744_s20 = sld [smem:[#allocation43_spill]] }
  0x6b   : > { %s2777_s15 = smov (!%p770_p4, %s2736_s15), 1  ;;  %s2745_s16 = sld [smem:[#allocation45_spill]] }
  0x6c   : > { %s2475_s4 = scalar_select %p773_p7, %s2737_s18, 1 }
  0x6d   : > { %p1597_p10 = scmp.ne.s32.totalorder %s2737_s18, 0 }
  0x6e   : > { %s1654_s24 = sshll.u32 %s2475_s4, 4  ;;  %s780_s14 = scalar_lea.vmem %s2739_s25, %s2475_s4 }
  0x6f   : > { %s777_s22 = scalar_lea.vmem %s2740_s29, %s1654_s24  ;;  %s2492_s12 = scalar_lea.vmem %s2741_s9, %s1654_s24 }
  0x70   : > { %s788_s21 = scalar_lea.vmem %s2742_s13, %s2475_s4  ;;  %s791_s30 = scalar_lea.vmem %s2743_s6, %s2475_s4 }
  0x71   : > { %s2505_s25 = scalar_lea.vmem %s2744_s20, %s1654_s24  ;;  %s1657_s10 = sshll.u32 %s2475_s4, 5 }
  0x72   : > { %s2511_s1 = scalar_lea.vmem %s2745_s16, %s1657_s10  ;;  %s2746_s9 = sshll.u32 %s2435_s3, 3 }
  0x73   : > { %s2515_s2 = scalar_lea.vmem [#allocation14], %s2746_s9  ;;  %806 = sbr.rel (%p1597_p10) target bundleno = 122 (0x7a), region = 104 }
  0x78   : > { %v807_v0 = vld [vmem:[%s2441_s28] sm:$0xff]  ;;  %vm808_vm0 = vcmask 261120  }
  0x79   : > { %809 = vst.msk [vmem:[%s2515_s2] sm:$0xff] %vm808_vm0, %v807_v0 }
  0x7a PF: > { %v1659_v1 = vld [vmem:[%s777_s22 + $0x8] sm:$0xff]  ;;  %v1658_v2 = vld [vmem:[%s777_s22] sm:$0xff]  ;;  %vm832_vm1 = vcmask 261120   ;;  %s2151_s13 = smov 104   ;;  %s2152_s16 = smov 120   ;;  %vm865_vm2 = vcmask 64512  }
  0x7b   : > { %842 = vmatpush.bf16.msra.mxu0 %v1659_v1  ;;  %v1804_v5 = vld [vmem:[%s780_s14] ss:$0 sm:$0xff]  ;;  %s2153_s17 = smov 112   ;;  %s2154_s11 = smov 96   ;;  %vm1007_vm3 = vcmask 1043456   ;;  %vm1092_vm4 = vcmask 130112  }
  0x7c   : > { %s2747_s18 = sld [smem:[#allocation35_spill]]  ;;  %s2156_s24 = smov 16   ;;  %vm1098_vm5 = vcmask 195712   ;;  %vm1104_vm6 = vcmask 261312   ;;  %vm1259_vm11 = vcmask 523264  }
  0x7d   : > { %s2157_s14 = smov 8   ;;  %s2158_s5 = smov 24  }
  0x7e   : > { %s2752_s10 = scalar_lea.vmem [#allocation8], %s2449_s8  ;;  %s2754_s4 = sld [smem:[#allocation26_spill]] }
  0x7f   : > { %843 = vmatpush.bf16.msra.mxu0 %v1658_v2  ;;  %s2755_s0 = scalar_lea.vmem [#allocation11], %s2449_s8  ;;  %s1311_s22 = scalar_lea.sflag [#allocation5], %s2435_s3 }
  0x80   : > { %v2521_v3 = vld [vmem:[%s2515_s2] sm:$0xff] }
  0x81   : > { %v811_v4 = vpack.c.bf16 %v2521_v3, %v2521_v3 }
  0x82   : > { %s2748_s6 = scalar_lea.vmem %s2747_s18, %s2777_s15  ;;  %s2155_s15 = smov 64  }
  0x83   : > { %1606 = vmatmul.msk.bf16.vlgmr.msra.gmra.mxu0 %vm832_vm1, %v811_v4  ;;  %v1805_v31 = vld [vmem:[%s2748_s6] ss:$0 sm:$0xff] }
  0x84   : > { %s1651_s29 = sshll.u32 %s2754_s4, 3 }
 0x100   : > { %v845_v6 = vpop.f32.mrf.mxu0 }
 0x101   : > { %v846_v7 = vadd.f32 %v1804_v5, %v845_v6 }
 0x103   : > { %v849_v8 = vpack.c.bf16 %v846_v7, %v846_v7 }
 0x105   : > { %855 = vrot.lane.b32.xlu1 %v849_v8, %s2151_s13  ;;  %851 = vrot.lane.b32.xlu0 %v849_v8, %s2152_s16  ;;  %v861_v10 = vunpack.c.l.b16 %v849_v8  ;;  %s2756_s13 = sld [smem:[#allocation49_spill]] }
 0x107   : > { %v2526_v11 = vpack.c.b16 %v861_v10, %v861_v10 }
 0x108   : > { %v847_v9 = vpop.f32.mrf.mxu0 }
 0x10b   : > { %s1321_s16 = scalar_lea.hbm %s2756_s13, %s1651_s29 }
 0x10c   : > { %s1325_s28 = sshll.u32 %s1321_s16, 4  ;;  %s1326_s28 = int_to_ptr.hbm [resolvable:$true] %s1325_s28 }
 0x10d   : > { %853 = vrot.lane.b32.xlu0 %v849_v8, %s2153_s17  ;;  %s2757_s17 = scalar_lea.vmem [#allocation12], %s2449_s8  ;;  %s2029_s18 = sshra.s32 %s1326_s28, 4  ;;  %s2030_s18 = int_to_ptr.hbm [resolvable:$true] %s2029_s18 }
 0x10e   : > { %s2031_s6 = scalar_lea.hbm %s2030_s18, 8  ;;  %p2036_p0 = scmp.lt.s32.totalorder %s2030_s18, %s2756_s13 }
 0x10f   : > { %p2032_p11 = scmp.ne.s32.totalorder %s2030_s18, %s2031_s6 }
 0x111   : > { %p2033_p1 = pnand %p2032_p11, %p2388_p12 }
 0x113   : > { %p2034_p3 = pneg %p2033_p1 }
 0x115   : > { %863 = vrot.lane.b32.xlu0 %v2526_v11, %s2154_s11 }
 0x177   : > { %v852_v12 = vpop.permute.xlu0 %851  ;;  %v856_v18 = vpop.permute.xlu1 %855 }
 0x178   : > { %v885_v13 = vunpack.c.l.b16 %v852_v12  ;;  %v931_v19 = vunpack.c.l.b16 %v856_v18 }
 0x17a   : > { %v2529_v14 = vpack.c.b16 %v885_v13, %v885_v13  ;;  %v932_v22 = vpack.c.b16 %v931_v19, %v931_v19 }
 0x17c   : > { %887 = vrot.lane.b32.xlu1 %v2529_v14, %s2154_s11 }
 0x17f   : > { %v854_v15 = vpop.permute.xlu0 %853 }
 0x180   : > { %v908_v16 = vunpack.c.l.b16 %v854_v15 }
 0x182   : > { %v2532_v17 = vpack.c.b16 %v908_v16, %v908_v16 }
 0x184   : > { %910 = vrot.lane.b32.xlu2 %v2532_v17, %s2154_s11 }
 0x187   : > { %v864_v20 = vpop.permute.xlu0 %863 }
 0x188   : > { %v870_v21 = vsel %vm865_vm2, %v864_v20, 0 }
 0x189   : > { %879 = vmatpush.bf16.xpose.msra.mxu1 %v870_v21 }
 0x18c   : > { %933 = vrot.lane.b32.xlu2 %v932_v22, %s2154_s11  ;;  %s1323_s11 = sshll.u32 %s2515_s2, 4  ;;  %s1324_s11 = int_to_ptr.vmem [resolvable:$true] %s1323_s11 }
 0x190   : > { %1607 = vmatmul.msk.bf16.vlgmr.msra.gmra.mxu1 %vm865_vm2, %v849_v8 }
 0x1de   : > { %v911_v23 = vpop.permute.xlu2 %910 }
 0x1df   : > { %v916_v24 = vsel %vm865_vm2, %v911_v23, 0 }
 0x1e0   : > { %925 = vmatpush.bf16.xpose.msra.mxu3 %v916_v24 }
 0x1e6   : > { %v934_v25 = vpop.permute.xlu2 %933 }
 0x1e7   : > { %1609 = vmatmul.msk.bf16.vlgmr.msra.gmra.mxu3 %vm865_vm2, %v854_v15  ;;  %v939_v26 = vsel %vm865_vm2, %v934_v25, 0 }
 0x1e8   : > { %948 = vmatpush.bf16.xpose.msrb.mxu0 %v939_v26 }
 0x1ee   : > { %v888_v27 = vpop.permute.xlu1 %887 }
 0x1ef   : > { %1610 = vmatmul.msk.bf16.vlgmr.msrb.gmra.mxu0 %vm865_vm2, %v856_v18  ;;  %v893_v28 = vsel %vm865_vm2, %v888_v27, 0 }
 0x1f0   : > { %902 = vmatpush.bf16.xpose.msra.mxu2 %v893_v28 }
 0x1f7   : > { %1608 = vmatmul.msk.bf16.vlgmr.msra.gmra.mxu2 %vm865_vm2, %v852_v12 }
 0x20d   : > { %v881_v29 = vpop.f32.mrf.mxu1 }
 0x20e   : > { %v882_v38 = vadd.f32 %v1805_v31, %v881_v29 }
 0x210   : > { %v954_v41 = vsel %vm865_vm2, %v882_v38, -inf }
 0x215   : > { %v883_v30 = vpop.f32.mrf.mxu1 }
 0x26a   : > { %v927_v32 = vpop.f32.mrf.mxu3 }
 0x26b   : > { %v928_v33 = vadd.f32 %v1805_v31, %v927_v32 }
 0x26c   : > { %v950_v34 = vpop.f32.mrf.mxu0 }
 0x26d   : > { %v951_v35 = vadd.f32 %v1805_v31, %v950_v34  ;;  %v960_v36 = vsel %vm865_vm2, %v928_v33, -inf }
 0x26e   : > { %961 = vmax.xlane.f32.xlu2 %v960_v36  ;;  %v1660_v36 = vld [vmem:[%s2492_s12] sm:$0xff] }
 0x26f   : > { %v963_v37 = vsel %vm865_vm2, %v951_v35, -inf }
 0x270   : > { %964 = vmax.xlane.f32.xlu0 %v963_v37 }
 0x272   : > { %v929_v39 = vpop.f32.mrf.mxu3 }
 0x274   : > { %v952_v40 = vpop.f32.mrf.mxu0 }
 0x276   : > { %955 = vmax.xlane.f32.xlu2 %v954_v41 }
 0x27a   : > { %v904_v42 = vpop.f32.mrf.mxu2 }
 0x27b   : > { %v905_v43 = vadd.f32 %v1805_v31, %v904_v42  ;;  %v1806_v42 = vld [vmem:[%s788_s21] ss:$0 sm:$0xff] }
 0x27d   : > { %v957_v44 = vsel %vm865_vm2, %v905_v43, -inf }
 0x27e   : > { %958 = vmax.xlane.f32.xlu1 %v957_v44 }
 0x282   : > { %v906_v45 = vpop.f32.mrf.mxu2 }
 0x2e1   : > { %v962_v46 = vpop.xlane.xlu2 %961 }
 0x2e2   : > { %v968_v47 = vsub.f32 %v928_v33, %v962_v46 }
 0x2e3   : > { %v965_v48 = vpop.xlane.xlu0 %964 }
 0x2e4   : > { %v974_v49 = vmul.f32 1.442695, %v968_v47  ;;  %v969_v50 = vsub.f32 %v951_v35, %v965_v48  ;;  %v1661_v35 = vld [vmem:[%s2492_s12 + $0x8] sm:$0xff]  ;;  %v2159_v48 = vmov 32.0  }
 0x2e6   : > { %1813 = vpow2.f32 %v974_v49  ;;  %v976_v51 = vmul.f32 1.442695, %v969_v50 }
 0x2e8   : > { %1815 = vpow2.f32 %v976_v51 }
 0x2e9   : > { %v956_v61 = vpop.xlane.xlu2 %955 }
 0x2ea   : > { %v966_v62 = vsub.f32 %v882_v38, %v956_v61  ;;  %v1667_v61 = vld [vmem:[%s2511_s1 + $0x18] sm:$0xff] }
 0x2ec   : > { %v1814_v52 = vpop.eup %1813  ;;  %v970_v63 = vmul.f32 1.442695, %v966_v62 }
 0x2ed   : > { %v984_v53 = vsel %vm865_vm2, %v1814_v52, 0.0 }
 0x2ee   : > { %v1816_v54 = vpop.eup %1815  ;;  %985 = vadd.xlane.f32.xlu2 %v984_v53 }
 0x2ef   : > { %v987_v55 = vsel %vm865_vm2, %v1816_v54, 0.0 }
 0x2f0   : > { %988 = vadd.xlane.f32.xlu0 %v987_v55 }
 0x2f1   : > { %v959_v56 = vpop.xlane.xlu1 %958 }
 0x2f2   : > { %v967_v57 = vsub.f32 %v905_v43, %v959_v56 }
 0x2f4   : > { %v972_v58 = vmul.f32 1.442695, %v967_v57 }
 0x2f6   : > { %1817 = vpow2.f32 %v972_v58 }
 0x2f7   : > { %1819 = vpow2.f32 %v970_v63 }
 0x2fc   : > { %v1818_v59 = vpop.eup %1817 }
 0x2fd   : > { %v981_v60 = vsel %vm865_vm2, %v1818_v59, 0.0  ;;  %v1820_v0 = vpop.eup %1819 }
 0x2fe   : > { %982 = vadd.xlane.f32.xlu1 %v981_v60  ;;  %v978_v1 = vsel %vm865_vm2, %v1820_v0, 0.0  ;;  %v1662_v60 = vld [vmem:[%s2505_s25] sm:$0xff] }
 0x304   : > { %1066 = vrot.lane.b32.xlu0 %v932_v22, %s2155_s15 }
 0x306   : > { %1045 = vrot.lane.b32.xlu2 %v2532_v17, %s2155_s15 }
 0x30c   : > { %1002 = vrot.lane.b32.xlu0 %v2526_v11, %s2155_s15 }
 0x317   : > { %1024 = vrot.lane.b32.xlu1 %v2529_v14, %s2155_s15 }
 0x341   : > { %979 = vadd.xlane.f32.xlu1 %v978_v1 }
 0x361   : > { %v986_v2 = vpop.xlane.xlu2 %985 }
 0x362   : > { %1821 = vrcp.f32 %v986_v2 }
 0x363   : > { %v989_v6 = vpop.xlane.xlu0 %988 }
 0x364   : > { %1823 = vrcp.f32 %v989_v6 }
 0x368   : > { %v1822_v4 = vpop.eup %1821 }
 0x369   : > { %v996_v5 = vmul.f32 %v1822_v4, %v1814_v52  ;;  %v1046_v7 = vpop.permute.xlu2 %1045 }
 0x36a   : > { %v1051_v8 = vsel %vm1007_vm3, %v1046_v7, 0  ;;  %v1824_v10 = vpop.eup %1823 }
 0x36b   : > { %1060 = vmatpush.bf16.msrb.mxu3 %v1051_v8  ;;  %v1000_v9 = vpack.c.bf16 %v996_v5, %v996_v5  ;;  %v997_v11 = vmul.f32 %v1824_v10, %v1816_v54 }
 0x36d   : > { %v1001_v14 = vpack.c.bf16 %v997_v11, %v997_v11 }
 0x36e   : > { %1613 = vmatmul.msk.bf16.vlgmr.msrb.gmra.mxu3 %vm865_vm2, %v1000_v9  ;;  %v1807_v9 = vld [vmem:[%s791_s30] ss:$0 sm:$0xff]  ;;  %s2753_s30 = scalar_lea.vmem [#allocation9], %s2449_s8 }
 0x36f   : > { %1267 = vmatpush.bf16.msra.mxu3 %v1667_v61 }
 0x371   : > { %v983_v15 = vpop.xlane.xlu1 %982 }
 0x372   : > { %1825 = vrcp.f32 %v983_v15 }
 0x376   : > { %v1067_v12 = vpop.permute.xlu0 %1066 }
 0x377   : > { %v1072_v13 = vsel %vm1007_vm3, %v1067_v12, 0 }
 0x378   : > { %1081 = vmatpush.bf16.msra.mxu0 %v1072_v13  ;;  %v1826_v18 = vpop.eup %1825 }
 0x379   : > { %v995_v19 = vmul.f32 %v1826_v18, %v1818_v59  ;;  %v1663_v59 = vld [vmem:[%s2505_s25 + $0x8] sm:$0xff]  ;;  %s2751_s25 = scalar_lea.vmem [#allocation6], %s2449_s8  ;;  %v1809_v18 = vld [vmem:[%s2752_s10] ss:$0 sm:$0xff]  ;;  %s2035_s8 = scalar_lea.hbm %s2756_s13, 16 }
 0x37a   : > { %v1808_v11 = vld [vmem:[%s2751_s25] ss:$0 sm:$0xff]  ;;  %p2037_p5 = scmp.lt.s32.totalorder %s2035_s8, %s2031_s6 }
 0x37b   : > { %1614 = vmatmul.msk.bf16.vlgmr.msra.gmra.mxu0 %vm865_vm2, %v1001_v14  ;;  %v999_v22 = vpack.c.bf16 %v995_v19, %v995_v19 }
 0x37c   : > { %p2038_p6 = por %p2037_p5, %p2036_p0 }
 0x37e   : > { %v1003_v16 = vpop.permute.xlu0 %1002  ;;  %p2039_p8 = pnand %p2038_p6, %p2034_p3 }
 0x37f   : > { %v1009_v17 = vsel %vm1007_vm3, %v1003_v16, 0  ;;  %v1665_v16 = vld [vmem:[%s2511_s1 + $0x8] sm:$0xff] }
 0x380   : > { %1018 = vmatpush.bf16.msrb.mxu1 %v1009_v17  ;;  %v1664_v17 = vld [vmem:[%s2511_s1] sm:$0xff] }
 0x384   : > { %1137 = vmatpush.bf16.msra.mxu1 %v1661_v35 }
 0x388   : > { %1138 = vmatpush.bf16.msra.mxu1 %v1660_v36 }
 0x389   : > { %v1025_v20 = vpop.permute.xlu1 %1024 }
 0x38a   : > { %v1030_v21 = vsel %vm1007_vm3, %v1025_v20, 0 }
 0x38b   : > { %1039 = vmatpush.bf16.msrb.mxu2 %v1030_v21 }
 0x38e   : > { %1612 = vmatmul.msk.bf16.vlgmr.msrb.gmra.mxu2 %vm865_vm2, %v999_v22 }
 0x38f   : > { %1214 = vmatpush.bf16.msra.mxu2 %v1663_v59 }
 0x393   : > { %1215 = vmatpush.bf16.msra.mxu2 %v1662_v60 }
 0x3b4   : > { %v980_v23 = vpop.xlane.xlu1 %979 }
 0x3b5   : > { %1827 = vrcp.f32 %v980_v23 }
 0x3b6   : > { %1829 = vrcp.f32 %v2159_v48 }
 0x3bb   : > { %v1828_v24 = vpop.eup %1827 }
 0x3bc   : > { %v994_v25 = vmul.f32 %v1828_v24, %v1820_v0  ;;  %v1830_v49 = vpop.eup %1829  ;;  %v1666_v0 = vld [vmem:[%s2511_s1 + $0x10] sm:$0xff]  ;;  %v1810_v24 = vld [vmem:[%s2753_s30] ss:$0 sm:$0xff] }
 0x3bd   : > { %v1151_v50 = vmul.f32 32.0, %v1830_v49  ;;  %vm1155_vm7 = vweird.f32 %v1830_v49  ;;  %1268 = vmatpush.bf16.msra.mxu3 %v1666_v0 }
 0x3be   : > { %v998_v26 = vpack.c.bf16 %v994_v25, %v994_v25 }
 0x3bf   : > { %v1152_v51 = vsub.f32 1.0, %v1151_v50 }
 0x3c0   : > { %1611 = vmatmul.msk.bf16.vlgmr.msrb.gmra.mxu1 %vm865_vm2, %v998_v26 }
 0x3c1   : > { %v1153_v52 = vmul.f32 %v1830_v49, %v1152_v51  ;;  %1269 = vmatpush.bf16.msra.mxu3 %v1665_v16 }
 0x3c3   : > { %v1154_v53 = vadd.f32 %v1830_v49, %v1153_v52 }
 0x3c5   : > { %v1156_v54 = vsel %vm1155_vm7, %v1830_v49, %v1154_v53  ;;  %1270 = vmatpush.bf16.msra.mxu3 %v1664_v17 }
 0x3f1   : > { %v1062_v27 = vpop.f32.mrf.mxu3 }
 0x3f2   : > { %1095 = vrot.lane.b32.xlu0 %v1062_v27, %s2156_s24 }
 0x3f8   : > { %v1083_v28 = vpop.f32.mrf.mxu0 }
 0x3f9   : > { %v1064_v29 = vpop.f32.mrf.mxu3 }
 0x400   : > { %v1085_v30 = vpop.f32.mrf.mxu0 }
 0x411   : > { %v1041_v31 = vpop.f32.mrf.mxu2 }
 0x412   : > { %1089 = vrot.lane.b32.xlu2 %v1041_v31, %s2157_s14 }
 0x419   : > { %v1043_v32 = vpop.f32.mrf.mxu2 }
 0x41a   : > { %1101 = vrot.lane.b32.xlu2 %v1083_v28, %s2158_s5 }
 0x43d   : > { %v1020_v33 = vpop.f32.mrf.mxu1 }
 0x43e   : > { %1087 = vst.msk [vmem:[#allocation2] sm:$0xff] %vm865_vm2, %v1020_v33 }
 0x445   : > { %v1022_v34 = vpop.f32.mrf.mxu1 }
 0x464   : > { %v1096_v38 = vpop.permute.xlu0 %1095 }
 0x46c   : > { %v1090_v37 = vpop.permute.xlu2 %1089 }
 0x46d   : > { %1093 = vst.msk [vmem:[#allocation2] sm:$0xff] %vm1092_vm4, %v1090_v37 }
 0x46e   : > { %1099 = vst.msk [vmem:[#allocation2] sm:$0xff] %vm1098_vm5, %v1096_v38 }
 0x474   : > { %v1102_v39 = vpop.permute.xlu2 %1101 }
 0x475   : > { %1105 = vst.msk [vmem:[#allocation2] sm:$0xff] %vm1104_vm6, %v1102_v39 }
 0x47c   : > { %v1106_v40 = vld [vmem:[#allocation2] sm:$0xff] }
 0x47d   : > { %v1107_v41 = vpack.c.bf16 %v1106_v40, %v1106_v40 }
 0x47f   : > { %1623 = vmatmul.msk.bf16.vlgmr.msra.gmra.mxu1 %vm832_vm1, %v1107_v41 }
 0x4fc   : > { %v1140_v43 = vpop.f32.mrf.mxu1 }
 0x4fd   : > { %v1141_v44 = vadd.f32 %v1806_v42, %v1140_v43 }
 0x4ff   : > { %v1144_v45 = vadd.f32 %v1141_v44, %v2521_v3  ;;  %v1811_v44 = vld [vmem:[%s2755_s0] ss:$0 sm:$0xff] }
 0x501   : > { %v1147_v46 = vsel %vm832_vm1, %v1144_v45, 0.0 }
 0x502   : > { %1148 = vadd.xlane.f32.xlu0 %v1147_v46 }
 0x504   : > { %v1142_v47 = vpop.f32.mrf.mxu1 }
 0x505   : > { %v1812_v47 = vld [vmem:[%s2757_s17] ss:$0 sm:$0xff] }
 0x575   : > { %v1149_v55 = vpop.xlane.xlu0 %1148 }
 0x576   : > { %v1157_v56 = vmul.f32 %v1156_v54, %v1149_v55 }
 0x578   : > { %v1158_v3 = vsub.f32 %v1144_v45, %v1157_v56 }
 0x57a   : > { %v1159_v57 = vmul.f32 %v1158_v3, %v1158_v3 }
 0x57c   : > { %v1160_v58 = vsel %vm832_vm1, %v1159_v57, 0.0 }
 0x57d   : > { %1161 = vadd.xlane.f32.xlu2 %v1160_v58 }
 0x5f0   : > { %v1162_v62 = vpop.xlane.xlu2 %1161 }
 0x5f1   : > { %v1163_v63 = vmul.f32 %v1162_v62, %v1156_v54 }
 0x5f3   : > { %v1164_v1 = vadd.f32 1e-05, %v1163_v63 }
 0x5f5   : > { %1831 = vrsqrt.f32 %v1164_v1  ;;  %vm1171_vm9 = vweird.f32 %v1164_v1 }
 0x5fb   : > { %v1832_v2 = vpop.eup %1831 }
 0x5fc   : > { %v1166_v4 = vmul.f32 %v1832_v2, %v1164_v1  ;;  %vm1172_vm8 = vweird.f32 %v1832_v2 }
 0x5fd   : > { %vm1173_vm10 = vmor %vm1171_vm9, %vm1172_vm8 }
 0x5fe   : > { %v1167_v5 = vmul.f32 %v1832_v2, %v1166_v4 }
 0x600   : > { %v1168_v6 = vmul.f32 0.5, %v1167_v5 }
 0x602   : > { %v1169_v7 = vsub.f32 1.5, %v1168_v6 }
 0x604   : > { %v1170_v8 = vmul.f32 %v1832_v2, %v1169_v7 }
 0x606   : > { %v1174_v10 = vsel %vm1173_vm10, %v1832_v2, %v1170_v8 }
 0x607   : > { %v1175_v12 = vmul.f32 %v1174_v10, %v1158_v3 }
 0x609   : > { %v1179_v13 = vmul.f32 %v1807_v9, %v1175_v12 }
 0x60b   : > { %v1183_v14 = vadd.f32 %v1808_v11, %v1179_v13 }
 0x60d   : > { %v1184_v15 = vpack.c.bf16 %v1183_v14, %v1183_v14 }
 0x60f   : > { %1632 = vmatmul.msk.bf16.vlgmr.msra.gmra.mxu2 %vm832_vm1, %v1184_v15 }
 0x692   : > { %v1217_v19 = vpop.f32.mrf.mxu2 }
 0x693   : > { %v1218_v20 = vadd.f32 %v1809_v18, %v1217_v19 }
 0x695   : > { %v1221_v21 = vmax.f32 %v1218_v20, 0.0 }
 0x697   : > { %v1222_v22 = vpack.c.bf16 %v1221_v21, %v1221_v21 }
 0x699   : > { %1649 = vmatmul.msk.bf16.vlgmr.msra.gmra.mxu3 %vm1259_vm11, %v1222_v22 }
 0x69a   : > { %v1219_v23 = vpop.f32.mrf.mxu2 }
 0x71c   : > { %v1272_v25 = vpop.f32.mrf.mxu3 }
 0x71d   : > { %v1273_v26 = vadd.f32 %v1810_v24, %v1272_v25 }
 0x71f   : > { %v1276_v27 = vadd.f32 %v1273_v26, %v1183_v14 }
 0x721   : > { %v1279_v28 = vsel %vm832_vm1, %v1276_v27, 0.0 }
 0x722   : > { %1280 = vadd.xlane.f32.xlu1 %v1279_v28 }
 0x724   : > { %v1274_v29 = vpop.f32.mrf.mxu3 }
 0x795   : > { %v1281_v30 = vpop.xlane.xlu1 %1280 }
 0x796   : > { %v1282_v31 = vmul.f32 %v1281_v30, %v1156_v54 }
 0x798   : > { %v1283_v32 = vsub.f32 %v1276_v27, %v1282_v31 }
 0x79a   : > { %v1284_v33 = vmul.f32 %v1283_v32, %v1283_v32 }
 0x79c   : > { %v1285_v34 = vsel %vm832_vm1, %v1284_v33, 0.0 }
 0x79d   : > { %1286 = vadd.xlane.f32.xlu1 %v1285_v34 }
 0x810   : > { %v1287_v35 = vpop.xlane.xlu1 %1286 }
 0x811   : > { %v1288_v36 = vmul.f32 %v1287_v35, %v1156_v54 }
 0x813   : > { %v1289_v37 = vadd.f32 1e-05, %v1288_v36 }
 0x815   : > { %1833 = vrsqrt.f32 %v1289_v37  ;;  %vm1296_vm13 = vweird.f32 %v1289_v37 }
 0x81b   : > { %v1834_v38 = vpop.eup %1833 }
 0x81c   : > { %v1291_v39 = vmul.f32 %v1834_v38, %v1289_v37  ;;  %vm1297_vm12 = vweird.f32 %v1834_v38 }
 0x81d   : > { %vm1298_vm14 = vmor %vm1296_vm13, %vm1297_vm12 }
 0x81e   : > { %v1292_v40 = vmul.f32 %v1834_v38, %v1291_v39 }
 0x820   : > { %v1293_v41 = vmul.f32 0.5, %v1292_v40 }
 0x822   : > { %v1294_v42 = vsub.f32 1.5, %v1293_v41 }
 0x824   : > { %v1295_v43 = vmul.f32 %v1834_v38, %v1294_v42 }
 0x826   : > { %v1299_v45 = vsel %vm1298_vm14, %v1834_v38, %v1295_v43 }
 0x827   : > { %v1300_v46 = vmul.f32 %v1299_v45, %v1283_v32 }
 0x829   : > { %v1304_v48 = vmul.f32 %v1811_v44, %v1300_v46 }
 0x82b   : > { %v1308_v49 = vadd.f32 %v1812_v47, %v1304_v48 }
 0x82d   : > { %1309 = vst.msk [vmem:[%s2515_s2] sm:$0xff] %vm832_vm1, %v1308_v49 }
 0x82e   : > { %2042 = shalt.err (!%p2039_p8)
}
 0x82f   : > { %1680 = dma.vmem_to_hbm [thread:$0]  (%p2388_p12), %s1324_s11, 128, %s1326_s28, %s1311_s22  }
 0x830 PF: > { %s2758_s3 = sld [smem:[#allocation22_spill]]  ;;  %p1706_p9 = scmp.ge.s32.totalorder %s2149_s23, 2 }
 0x832   : > { %p1702_p2 = pnand %p1706_p9, %p2397_p13 }
 0x834   : > { %p1703_p4 = pneg %p1702_p2 }
 0x836   : > { %s1337_s7 = sand.u32 1, %s2758_s3  }
 0x837   : > { %s1338_s27 = scalar_lea.sflag [#allocation5], %s1337_s7 }
 0x838   : > { %2104 = dma.done.wait (%p1703_p4), %s1338_s27, 128  }
 0x839   : > { %2106 = vsyncadd (%p1703_p4), %s1338_s27, 4294967168  ;;  %s39_s23 = sadd.s32 1, %s2149_s23   ;;  %s2760_s29 = sld [smem:[#allocation20_spill]] }
 0x83a   : > { %p36_p7 = scmp.ge.s32.totalorder %s39_s23, 6   ;;  %s2761_s30 = sld [smem:[#allocation21_spill]] }
 0x83b   : > { %s2762_s15 = sld [smem:[#allocation32_spill]] }
 0x83c   : > { %s2763_s16 = sld [smem:[#allocation23_spill]] }
 0x83d   : > { %s2764_s17 = sld [smem:[#allocation24_spill]] }
 0x83e   : > { %s2765_s18 = sld [smem:[#allocation33_spill]]  ;;  %38 = sbr.rel (!%p36_p7) target bundleno = 31 (0x1f), region = 210 }
 0x83f   : > { %s2766_s19 = sld [smem:[#allocation27_spill]] }
 0x840   : > { %s2767_s20 = sld [smem:[#allocation28_spill]] }
 0x841   : > { %s2768_s21 = sld [smem:[#allocation29_spill]] }
 0x842   : > { %s2769_s22 = sld [smem:[#allocation30_spill]] }
 0x843   :  { %1344 = vsyncpa [#allocation4], 1 }
 0x844   :  { %1346 = vsyncpa [#allocation4 + $0x1], 1 }
 0x845   :  { %1347 = vsyncpa [#allocation7], 1 }
 0x846   :  { %1349 = vsyncpa [#allocation7 + $0x1], 1 }
 0x847   :  { %1350 = vsyncpa [#allocation10], 1 }
 0x848   :  { %1352 = vsyncpa [#allocation10 + $0x1], 1 }
 0x849   :  { %1353 = vsyncpa [#allocation13], 1 }
 0x84a   :  { %1355 = vsyncpa [#allocation13 + $0x1], 1 }
 0x84b   :  { %1356 = vsyncpa [#allocation5], 1 }
 0x84c   :  { %1358 = vsyncpa [#allocation5 + $0x1], 1 }

</bundles_post_ra>
